<compile_context>
chip_gen: v7x
topology: tpu7x:2x2x1
jax: 0.10.0
libtpu: 0.0.40
codegen_flags: <defaults>
</compile_context>

<pallas_src>
import functools

import jax
import jax.numpy as jnp
from jax import lax
from jax.experimental import pallas as pl
from jax.experimental.pallas import tpu as pltpu


def _sigmoid(v):
    # Exact f32 sigmoid (keeps the tight correctness tolerance; the divide is on
    # tiny tensors only).
    return 1.0 / (1.0 + jnp.exp(-v))


# ----------------------------- fused MEF kernel ------------------------------
def _mef_fused_kernel(x1_ref, x2_ref, x3_ref, w7_ref, aff_ref,
                      w1t_ref, w2_ref, wc_ref, bc_ref,
                      o_ref, mpad_ref, *, width, c_splits):
    # x*_ref : (B, C_k, HW) input slabs (the channel concat is never materialized)
    # w7_ref : (7, 7) SMEM 7x7 conv weights     aff_ref: (2,) SMEM [w_sa, b_sa]
    # w1t_ref: (Cx, mip) fc1^T   w2_ref: (Cx, mip) fc2   wc_ref: (Cout, Cx)   bc_ref: (Cout, 1)
    # o_ref  : (B, Cout, HW)
    # mpad_ref: (B, HW + 2*pad) f32 VMEM scratch — zero-padded flat channel-max map
    b, _, hw = x1_ref.shape
    c1, c2, c3 = c_splits
    pad = 3 * width + 3

    x1 = x1_ref[...].astype(jnp.float32)
    x2 = x2_ref[...].astype(jnp.float32)
    x3 = x3_ref[...].astype(jnp.float32)

    # ---- SpatialAttention: channel max -> 7x7 conv (flat, zero padded) -> sigmoid
    m = jnp.maximum(jnp.maximum(jnp.max(x1, axis=1), jnp.max(x2, axis=1)),
                    jnp.max(x3, axis=1))                                  # (B, HW)
    mpad_ref[...] = jnp.zeros_like(mpad_ref)
    mpad_ref[:, pad:pad + hw] = m

    # pixel column index (for masking taps that would cross a row boundary)
    col = lax.broadcasted_iota(jnp.int32, (1, hw), 1) % width             # (1, HW)

    conv = jnp.zeros((b, hw), jnp.float32)
    for dj in range(7):
        oj = dj - 3
        part = jnp.zeros((b, hw), jnp.float32)
        for di in range(7):
            off = pad + (di - 3) * width + oj
            part = part + w7_ref[di, dj] * mpad_ref[:, off:off + hw]
        if oj == 0:
            conv = conv + part
        else:
            valid = jnp.logical_and(col + oj >= 0, col + oj < width)      # (1, HW)
            conv = conv + jnp.where(valid, part, 0.0)

    sa = _sigmoid(conv) * aff_ref[0] + aff_ref[1]                         # (B, HW)
    sab = sa[:, None, :]                                                  # (B, 1, HW)

    # ---- y = x * sa (per slab)
    y1 = x1 * sab
    y2 = x2 * sab
    y3 = x3 * sab

    # ---- ChannelAttention: global max pool -> fc1 -> relu -> fc2 -> sigmoid
    w1t = w1t_ref[...].astype(jnp.float32)                                # (Cx, mip)
    w2w = w2_ref[...].astype(jnp.float32)                                 # (Cx, mip)

    p1 = jnp.max(y1, axis=2)                                              # (B, c1)
    p2 = jnp.max(y2, axis=2)                                              # (B, c2)
    p3 = jnp.max(y3, axis=2)                                              # (B, c3)

    h = (jnp.sum(p1[:, :, None] * w1t[None, 0:c1, :], axis=1)
         + jnp.sum(p2[:, :, None] * w1t[None, c1:c1 + c2, :], axis=1)
         + jnp.sum(p3[:, :, None] * w1t[None, c1 + c2:, :], axis=1))      # (B, mip)
    h = jnp.maximum(h, 0.0)                                               # relu
    s = _sigmoid(jnp.sum(h[:, None, :] * w2w[None, :, :], axis=2))        # (B, Cx)

    # ---- 1x1 output conv: fold the per-channel scale s into the conv weights and
    #      contract each slab on the MXU; add bias and modulate by sa.
    wc = wc_ref[...].astype(jnp.float32)                                  # (Cout, Cx)
    w_eff1 = wc[None, :, 0:c1] * s[:, None, 0:c1]                         # (B, Cout, c1)
    w_eff2 = wc[None, :, c1:c1 + c2] * s[:, None, c1:c1 + c2]
    w_eff3 = wc[None, :, c1 + c2:] * s[:, None, c1 + c2:]

    out = jnp.einsum('boc,bch->boh', w_eff1, y1,
                     preferred_element_type=jnp.float32)
    out = out + jnp.einsum('boc,bch->boh', w_eff2, y2,
                           preferred_element_type=jnp.float32)
    out = out + jnp.einsum('boc,bch->boh', w_eff3, y3,
                           preferred_element_type=jnp.float32)            # (B, Cout, HW)

    out = (out + bc_ref[...][None]) * sab
    o_ref[...] = out.astype(o_ref.dtype)


def _pick_batch_block(n, per_elem_bytes, target_bytes=1 << 20, min_steps=2):
    """Largest divisor of n with <= ~1 MiB per step, keeping >=2 grid steps (v7x)."""
    best = 1
    for b in range(1, n + 1):
        if n % b:
            continue
        steps = n // b
        if n >= min_steps and steps < min_steps:
            continue
        if b * per_elem_bytes <= target_bytes:
            best = b
    return best


def _mef_fused(x1, x2, x3, pp, width):
    n, c1, hw = x1.shape
    c2, c3 = x2.shape[1], x3.shape[1]
    cx = c1 + c2 + c3
    cout = pp["wc"].shape[0]
    mip = pp["w1t"].shape[1]
    pad = 3 * width + 3

    per_elem_bytes = (cx + cout) * hw * x1.dtype.itemsize
    b_blk = _pick_batch_block(n, per_elem_bytes)
    grid = (n // b_blk,)

    kernel = functools.partial(_mef_fused_kernel, width=width, c_splits=(c1, c2, c3))

    return pl.pallas_call(
        kernel,
        out_shape=jax.ShapeDtypeStruct((n, cout, hw), x1.dtype),
        grid_spec=pltpu.PrefetchScalarGridSpec(
            num_scalar_prefetch=0,
            grid=grid,
            in_specs=[
                pl.BlockSpec((b_blk, c1, hw), lambda i: (i, 0, 0)),          # in1 slab
                pl.BlockSpec((b_blk, c2, hw), lambda i: (i, 0, 0)),          # in2 slab
                pl.BlockSpec((b_blk, c3, hw), lambda i: (i, 0, 0)),          # in3 slab
                pl.BlockSpec(memory_space=pltpu.MemorySpace.SMEM),           # w7 (7,7)
                pl.BlockSpec(memory_space=pltpu.MemorySpace.SMEM),           # [w_sa, b_sa]
                pl.BlockSpec((cx, mip), lambda i: (0, 0)),                   # fc1^T
                pl.BlockSpec((cx, mip), lambda i: (0, 0)),                   # fc2
                pl.BlockSpec((cout, cx), lambda i: (0, 0)),                  # 1x1 conv W
                pl.BlockSpec((cout, 1), lambda i: (0, 0)),                   # 1x1 conv b
            ],
            out_specs=pl.BlockSpec((b_blk, cout, hw), lambda i: (i, 0, 0)),
            scratch_shapes=[pltpu.VMEM((b_blk, hw + 2 * pad), jnp.float32)],
        ),
        compiler_params=pltpu.CompilerParams(dimension_semantics=("parallel",)),
    )(x1, x2, x3, pp["w7"], pp["aff"], pp["w1t"], pp["w2"], pp["wc"], pp["bc"])


# --------------------------- parameter preprocessing --------------------------
def prepare_params(raw):
    """One-time prep (hoisted out of the forward): transpose/stack/reshape of weights."""
    return {
        "w7":  raw["w7"].astype(jnp.float32),                                    # (7, 7)
        "aff": jnp.stack([raw["sa_w"], raw["sa_b"]]).astype(jnp.float32),        # (2,)
        "w1t": raw["w1"].T.astype(jnp.float32),                                  # (Cx, mip)
        "w2":  raw["w2"].astype(jnp.float32),                                    # (Cx, mip)
        "wc":  raw["wc"].astype(jnp.float32),                                    # (Cout, Cx)
        "bc":  raw["bc"].reshape(-1, 1).astype(jnp.float32),                     # (Cout, 1)
    }


# ------------------------------- MEF forward ----------------------------------
def _maybe_resize(x, spatial):
    if x.shape[2:] == tuple(spatial):
        return x
    # TODO(synk): bilinear resize (F.interpolate) stays plain-JAX (jax.image.resize);
    # only taken when input spatial sizes differ.
    return jax.image.resize(x, x.shape[:2] + tuple(spatial), method="bilinear")


def mef_forward(pp, in1, in2=None, in3=None):
    if in2 is not None and in3 is not None:
        tgt = in2.shape[2:]
        in1 = _maybe_resize(in1, tgt)
        in3 = _maybe_resize(in3, tgt)
    elif in2 is not None and in3 is None:
        in2 = _maybe_resize(in2, in1.shape[2:])
        in3 = in1
    else:
        # The PyTorch module would fail on torch.cat with a missing in2; mirror that.
        raise ValueError("MEF requires in2 (matches the PyTorch module).")

    n, _, hgt, wid = in1.shape
    hw = hgt * wid
    # Lane-dense views (pixels on the lane axis); these reshapes are free in XLA.
    x1 = in1.reshape(n, in1.shape[1], hw)
    x2 = in2.reshape(n, in2.shape[1], hw)
    x3 = in3.reshape(n, in3.shape[1], hw)

    out = _mef_fused(x1, x2, x3, pp, wid)
    return out.reshape(n, -1, hgt, wid)


# --------------------------- pure-JAX reference -------------------------------
def mef_ref(params, in1, in2, in3):
    x = jnp.concatenate([in1, in2, in3], axis=1)
    m = jnp.max(x, axis=1, keepdims=True)
    conv = lax.conv_general_dilated(
        m, params["w7"].reshape(1, 1, 7, 7), window_strides=(1, 1),
        padding=((3, 3), (3, 3)), dimension_numbers=("NCHW", "OIHW", "NCHW"))
    sa = jax.nn.sigmoid(conv) * params["sa_w"] + params["sa_b"]
    y = x * sa
    p = jnp.max(y, axis=(2, 3), keepdims=True)
    h = jax.nn.relu(jnp.einsum("mc,ncij->nmij", params["w1"], p))
    s = jax.nn.sigmoid(jnp.einsum("cm,nmij->ncij", params["w2"], h))
    ca_out = y * s
    out = jnp.einsum("oc,nchw->nohw", params["wc"], ca_out)
    out = out + params["bc"].reshape(1, -1, 1, 1)
    return out * sa


if __name__ == "__main__":
    key = jax.random.PRNGKey(0)
    keys = jax.random.split(key, 10)

    N, C_in, Hgt, Wid = 2, 8, 16, 16          # three feature maps, 8 channels each
    int_channels = 3 * C_in                   # 24 channels after (virtual) concat
    num_channels = 16                          # MEF output channels
    mip = min(8, int_channels // 16)           # ChannelAttention hidden width (=1)
    assert mip >= 1

    raw = {
        "w7":   jax.random.normal(keys[0], (7, 7), jnp.float32) * 0.1,
        "sa_w": jax.random.normal(keys[1], (), jnp.float32) * 0.5 + 1.0,
        "sa_b": jax.random.normal(keys[2], (), jnp.float32) * 0.1,
        "w1":   jax.random.normal(keys[3], (mip, int_channels), jnp.float32) * 0.2,
        "w2":   jax.random.normal(keys[4], (int_channels, mip), jnp.float32) * 0.2,
        "wc":   jax.random.normal(keys[5], (num_channels, int_channels), jnp.float32) * 0.1,
        "bc":   jax.random.normal(keys[6], (num_channels,), jnp.float32) * 0.1,
    }
    pp = prepare_params(raw)   # one-time weight prep, outside the jitted forward

    in1 = jax.random.normal(keys[7], (N, C_in, Hgt, Wid), jnp.float32)
    in2 = jax.random.normal(keys[8], (N, C_in, Hgt, Wid), jnp.float32)
    in3 = jax.random.normal(keys[9], (N, C_in, Hgt, Wid), jnp.float32)

    fwd = jax.jit(mef_forward)
    out = jax.block_until_ready(fwd(pp, in1, in2, in3))

    ref = mef_ref(raw, in1, in2, in3)
    assert out.shape == (N, num_channels, Hgt, Wid), out.shape
    assert out.dtype == jnp.float32
    assert jnp.allclose(out, ref, atol=2e-4, rtol=2e-4), \
        float(jnp.max(jnp.abs(out - ref)))

    print("KERNEL_OK")
</pallas_src>

<mosaic_0001>
module attributes {stable_mosaic.version = 11 : i64} {
  func.func @_mef_fused_kernel(%arg0: i32, %arg1: memref<1x8x256xf32, #tpu.memory_space<vmem>>, %arg2: memref<1x8x256xf32, #tpu.memory_space<vmem>>, %arg3: memref<1x8x256xf32, #tpu.memory_space<vmem>>, %arg4: memref<7x7xf32, #tpu.memory_space<smem>>, %arg5: memref<2xf32, #tpu.memory_space<smem>>, %arg6: memref<24x1xf32, #tpu.memory_space<vmem>>, %arg7: memref<24x1xf32, #tpu.memory_space<vmem>>, %arg8: memref<16x24xf32, #tpu.memory_space<vmem>>, %arg9: memref<16x1xf32, #tpu.memory_space<vmem>>, %arg10: memref<1x16x256xf32, #tpu.memory_space<vmem>>, %arg11: memref<1x358xf32, #tpu.memory_space<vmem>>) attributes {dimension_semantics = [#tpu.dimension_semantics<parallel>], iteration_bounds = array<i64: 2>, scalar_prefetch = 0 : i64, scratch_operands = 1 : i64, tpu.core_type = #tpu.core_type<tc>, window_params = [{transform_indices = @transform_0, window_bounds = array<i64: 1, 8, 256>}, {transform_indices = @transform_1, window_bounds = array<i64: 1, 8, 256>}, {transform_indices = @transform_2, window_bounds = array<i64: 1, 8, 256>}, {transform_indices = @transform_3, window_bounds = array<i64: 7, 7>}, {transform_indices = @transform_4, window_bounds = array<i64: 2>}, {pipeline_mode = #tpu.pipeline_mode<synchronous>, transform_indices = @transform_5, window_bounds = array<i64: 24, 1>}, {pipeline_mode = #tpu.pipeline_mode<synchronous>, transform_indices = @transform_6, window_bounds = array<i64: 24, 1>}, {pipeline_mode = #tpu.pipeline_mode<synchronous>, transform_indices = @transform_7, window_bounds = array<i64: 16, 24>}, {pipeline_mode = #tpu.pipeline_mode<synchronous>, transform_indices = @transform_8, window_bounds = array<i64: 16, 1>}, {transform_indices = @transform_9, window_bounds = array<i64: 1, 16, 256>}]} {
    %c0 = arith.constant 0 : index
    %c0_0 = arith.constant 0 : index
    %c0_1 = arith.constant 0 : index
    %0 = vector.load %arg1[%c0, %c0_0, %c0_1] : memref<1x8x256xf32, #tpu.memory_space<vmem>>, vector<1x8x256xf32>
    %c0_2 = arith.constant 0 : index
    %c0_3 = arith.constant 0 : index
    %c0_4 = arith.constant 0 : index
    %1 = vector.load %arg2[%c0_2, %c0_3, %c0_4] : memref<1x8x256xf32, #tpu.memory_space<vmem>>, vector<1x8x256xf32>
    %c0_5 = arith.constant 0 : index
    %c0_6 = arith.constant 0 : index
    %c0_7 = arith.constant 0 : index
    %2 = vector.load %arg3[%c0_5, %c0_6, %c0_7] : memref<1x8x256xf32, #tpu.memory_space<vmem>>, vector<1x8x256xf32>
    %cst = arith.constant dense<0xFF800000> : vector<1x256xf32>
    %3 = vector.multi_reduction <maximumf>, %0, %cst [1] : vector<1x8x256xf32> to vector<1x256xf32>
    %cst_8 = arith.constant dense<0xFF800000> : vector<1x256xf32>
    %4 = vector.multi_reduction <maximumf>, %1, %cst_8 [1] : vector<1x8x256xf32> to vector<1x256xf32>
    %5 = arith.maximumf %3, %4 : vector<1x256xf32>
    %cst_9 = arith.constant dense<0xFF800000> : vector<1x256xf32>
    %6 = vector.multi_reduction <maximumf>, %2, %cst_9 [1] : vector<1x8x256xf32> to vector<1x256xf32>
    %7 = arith.maximumf %5, %6 : vector<1x256xf32>
    %cst_10 = arith.constant 0.000000e+00 : f32
    %8 = vector.broadcast %cst_10 : f32 to vector<1x358xf32>
    %c0_11 = arith.constant 0 : index
    %c0_12 = arith.constant 0 : index
    %9 = vector.load %arg11[%c0_11, %c0_12] : memref<1x358xf32, #tpu.memory_space<vmem>>, vector<1x358xf32>
    tpu.vector_store %arg11[%c0_11, %c0_12], %8 {strides = array<i32>} : memref<1x358xf32, #tpu.memory_space<vmem>>, vector<1x358xf32>,
    %c0_13 = arith.constant 0 : index
    %c51 = arith.constant 51 : index
    %10 = vector.load %arg11[%c0_13, %c51] : memref<1x358xf32, #tpu.memory_space<vmem>>, vector<1x256xf32>
    tpu.vector_store %arg11[%c0_13, %c51], %7 {strides = array<i32>} : memref<1x358xf32, #tpu.memory_space<vmem>>, vector<1x256xf32>,
    %11 = tpu.iota {dimensions = array<i32: 1>} : vector<1x256xi32>
    %c16_i32 = arith.constant 16 : i32
    %c0_i32 = arith.constant 0 : i32
    %12 = arith.cmpi eq, %c16_i32, %c0_i32 : i32
    %c1_i32 = arith.constant 1 : i32
    %13 = arith.select %12, %c1_i32, %c16_i32 : i32
    %14 = vector.broadcast %13 : i32 to vector<1x256xi32>
    %15 = arith.remsi %11, %14 : vector<1x256xi32>
    %c0_i32_14 = arith.constant 0 : i32
    %16 = vector.broadcast %c0_i32_14 : i32 to vector<1x256xi32>
    %17 = arith.cmpi ne, %15, %16 : vector<1x256xi32>
    %c0_i32_15 = arith.constant 0 : i32
    %18 = vector.broadcast %c0_i32_15 : i32 to vector<1x256xi32>
    %19 = arith.cmpi slt, %15, %18 : vector<1x256xi32>
    %c0_i32_16 = arith.constant 0 : i32
    %20 = arith.cmpi slt, %13, %c0_i32_16 : i32
    %21 = vector.broadcast %20 : i1 to vector<1x256xi1>
    %22 = vector.broadcast %21 : vector<1x256xi1> to vector<1x256xi1>
    %23 = arith.xori %19, %22 : vector<1x256xi1>
    %24 = arith.andi %23, %17 : vector<1x256xi1>
    %25 = vector.broadcast %13 : i32 to vector<1x256xi32>
    %26 = arith.addi %15, %25 : vector<1x256xi32>
    %27 = arith.select %24, %26, %15 : vector<1x256xi1>, vector<1x256xi32>
    %cst_17 = arith.constant 0.000000e+00 : f32
    %28 = vector.broadcast %cst_17 : f32 to vector<1x256xf32>
    %cst_18 = arith.constant 0.000000e+00 : f32
    %29 = vector.broadcast %cst_18 : f32 to vector<1x256xf32>
    %c0_19 = arith.constant 0 : index
    %c0_20 = arith.constant 0 : index
    %30 = memref.load %arg4[%c0_19, %c0_20] : memref<7x7xf32, #tpu.memory_space<smem>>
    %c0_21 = arith.constant 0 : index
    %c0_22 = arith.constant 0 : index
    %31 = vector.load %arg11[%c0_21, %c0_22] : memref<1x358xf32, #tpu.memory_space<vmem>>, vector<1x256xf32>
    %32 = vector.broadcast %30 : f32 to vector<1x256xf32>
    %33 = arith.mulf %32, %31 : vector<1x256xf32>
    %34 = arith.addf %29, %33 : vector<1x256xf32>
    %c1 = arith.constant 1 : index
    %c0_23 = arith.constant 0 : index
    %35 = memref.load %arg4[%c1, %c0_23] : memref<7x7xf32, #tpu.memory_space<smem>>
    %c0_24 = arith.constant 0 : index
    %c16 = arith.constant 16 : index
    %36 = vector.load %arg11[%c0_24, %c16] : memref<1x358xf32, #tpu.memory_space<vmem>>, vector<1x256xf32>
    %37 = vector.broadcast %35 : f32 to vector<1x256xf32>
    %38 = arith.mulf %37, %36 : vector<1x256xf32>
    %39 = arith.addf %34, %38 : vector<1x256xf32>
    %c2 = arith.constant 2 : index
    %c0_25 = arith.constant 0 : index
    %40 = memref.load %arg4[%c2, %c0_25] : memref<7x7xf32, #tpu.memory_space<smem>>
    %c0_26 = arith.constant 0 : index
    %c32 = arith.constant 32 : index
    %41 = vector.load %arg11[%c0_26, %c32] : memref<1x358xf32, #tpu.memory_space<vmem>>, vector<1x256xf32>
    %42 = vector.broadcast %40 : f32 to vector<1x256xf32>
    %43 = arith.mulf %42, %41 : vector<1x256xf32>
    %44 = arith.addf %39, %43 : vector<1x256xf32>
    %c3 = arith.constant 3 : index
    %c0_27 = arith.constant 0 : index
    %45 = memref.load %arg4[%c3, %c0_27] : memref<7x7xf32, #tpu.memory_space<smem>>
    %c0_28 = arith.constant 0 : index
    %c48 = arith.constant 48 : index
    %46 = vector.load %arg11[%c0_28, %c48] : memref<1x358xf32, #tpu.memory_space<vmem>>, vector<1x256xf32>
    %47 = vector.broadcast %45 : f32 to vector<1x256xf32>
    %48 = arith.mulf %47, %46 : vector<1x256xf32>
    %49 = arith.addf %44, %48 : vector<1x256xf32>
    %c4 = arith.constant 4 : index
    %c0_29 = arith.constant 0 : index
    %50 = memref.load %arg4[%c4, %c0_29] : memref<7x7xf32, #tpu.memory_space<smem>>
    %c0_30 = arith.constant 0 : index
    %c64 = arith.constant 64 : index
    %51 = vector.load %arg11[%c0_30, %c64] : memref<1x358xf32, #tpu.memory_space<vmem>>, vector<1x256xf32>
    %52 = vector.broadcast %50 : f32 to vector<1x256xf32>
    %53 = arith.mulf %52, %51 : vector<1x256xf32>
    %54 = arith.addf %49, %53 : vector<1x256xf32>
    %c5 = arith.constant 5 : index
    %c0_31 = arith.constant 0 : index
    %55 = memref.load %arg4[%c5, %c0_31] : memref<7x7xf32, #tpu.memory_space<smem>>
    %c0_32 = arith.constant 0 : index
    %c80 = arith.constant 80 : index
    %56 = vector.load %arg11[%c0_32, %c80] : memref<1x358xf32, #tpu.memory_space<vmem>>, vector<1x256xf32>
    %57 = vector.broadcast %55 : f32 to vector<1x256xf32>
    %58 = arith.mulf %57, %56 : vector<1x256xf32>
    %59 = arith.addf %54, %58 : vector<1x256xf32>
    %c6 = arith.constant 6 : index
    %c0_33 = arith.constant 0 : index
    %60 = memref.load %arg4[%c6, %c0_33] : memref<7x7xf32, #tpu.memory_space<smem>>
    %c0_34 = arith.constant 0 : index
    %c96 = arith.constant 96 : index
    %61 = vector.load %arg11[%c0_34, %c96] : memref<1x358xf32, #tpu.memory_space<vmem>>, vector<1x256xf32>
    %62 = vector.broadcast %60 : f32 to vector<1x256xf32>
    %63 = arith.mulf %62, %61 : vector<1x256xf32>
    %64 = arith.addf %59, %63 : vector<1x256xf32>
    %c-3_i32 = arith.constant -3 : i32
    %65 = vector.broadcast %c-3_i32 : i32 to vector<1x256xi32>
    %66 = arith.addi %27, %65 : vector<1x256xi32>
    %c0_i32_35 = arith.constant 0 : i32
    %67 = vector.broadcast %c0_i32_35 : i32 to vector<1x256xi32>
    %68 = arith.cmpi sge, %66, %67 : vector<1x256xi32>
    %c-3_i32_36 = arith.constant -3 : i32
    %69 = vector.broadcast %c-3_i32_36 : i32 to vector<1x256xi32>
    %70 = arith.addi %27, %69 : vector<1x256xi32>
    %c16_i32_37 = arith.constant 16 : i32
    %71 = vector.broadcast %c16_i32_37 : i32 to vector<1x256xi32>
    %72 = arith.cmpi slt, %70, %71 : vector<1x256xi32>
    %73 = arith.andi %68, %72 : vector<1x256xi1>
    %cst_38 = arith.constant 0.000000e+00 : f32
    %74 = vector.broadcast %cst_38 : f32 to vector<1x256xf32>
    %75 = arith.select %73, %64, %74 : vector<1x256xi1>, vector<1x256xf32>
    %76 = arith.addf %28, %75 : vector<1x256xf32>
    %cst_39 = arith.constant 0.000000e+00 : f32
    %77 = vector.broadcast %cst_39 : f32 to vector<1x256xf32>
    %c0_40 = arith.constant 0 : index
    %c1_41 = arith.constant 1 : index
    %78 = memref.load %arg4[%c0_40, %c1_41] : memref<7x7xf32, #tpu.memory_space<smem>>
    %c0_42 = arith.constant 0 : index
    %c1_43 = arith.constant 1 : index
    %79 = vector.load %arg11[%c0_42, %c1_43] : memref<1x358xf32, #tpu.memory_space<vmem>>, vector<1x256xf32>
    %80 = vector.broadcast %78 : f32 to vector<1x256xf32>
    %81 = arith.mulf %80, %79 : vector<1x256xf32>
    %82 = arith.addf %77, %81 : vector<1x256xf32>
    %c1_44 = arith.constant 1 : index
    %c1_45 = arith.constant 1 : index
    %83 = memref.load %arg4[%c1_44, %c1_45] : memref<7x7xf32, #tpu.memory_space<smem>>
    %c0_46 = arith.constant 0 : index
    %c17 = arith.constant 17 : index
    %84 = vector.load %arg11[%c0_46, %c17] : memref<1x358xf32, #tpu.memory_space<vmem>>, vector<1x256xf32>
    %85 = vector.broadcast %83 : f32 to vector<1x256xf32>
    %86 = arith.mulf %85, %84 : vector<1x256xf32>
    %87 = arith.addf %82, %86 : vector<1x256xf32>
    %c2_47 = arith.constant 2 : index
    %c1_48 = arith.constant 1 : index
    %88 = memref.load %arg4[%c2_47, %c1_48] : memref<7x7xf32, #tpu.memory_space<smem>>
    %c0_49 = arith.constant 0 : index
    %c33 = arith.constant 33 : index
    %89 = vector.load %arg11[%c0_49, %c33] : memref<1x358xf32, #tpu.memory_space<vmem>>, vector<1x256xf32>
    %90 = vector.broadcast %88 : f32 to vector<1x256xf32>
    %91 = arith.mulf %90, %89 : vector<1x256xf32>
    %92 = arith.addf %87, %91 : vector<1x256xf32>
    %c3_50 = arith.constant 3 : index
    %c1_51 = arith.constant 1 : index
    %93 = memref.load %arg4[%c3_50, %c1_51] : memref<7x7xf32, #tpu.memory_space<smem>>
    %c0_52 = arith.constant 0 : index
    %c49 = arith.constant 49 : index
    %94 = vector.load %arg11[%c0_52, %c49] : memref<1x358xf32, #tpu.memory_space<vmem>>, vector<1x256xf32>
    %95 = vector.broadcast %93 : f32 to vector<1x256xf32>
    %96 = arith.mulf %95, %94 : vector<1x256xf32>
    %97 = arith.addf %92, %96 : vector<1x256xf32>
    %c4_53 = arith.constant 4 : index
    %c1_54 = arith.constant 1 : index
    %98 = memref.load %arg4[%c4_53, %c1_54] : memref<7x7xf32, #tpu.memory_space<smem>>
    %c0_55 = arith.constant 0 : index
    %c65 = arith.constant 65 : index
    %99 = vector.load %arg11[%c0_55, %c65] : memref<1x358xf32, #tpu.memory_space<vmem>>, vector<1x256xf32>
    %100 = vector.broadcast %98 : f32 to vector<1x256xf32>
    %101 = arith.mulf %100, %99 : vector<1x256xf32>
    %102 = arith.addf %97, %101 : vector<1x256xf32>
    %c5_56 = arith.constant 5 : index
    %c1_57 = arith.constant 1 : index
    %103 = memref.load %arg4[%c5_56, %c1_57] : memref<7x7xf32, #tpu.memory_space<smem>>
    %c0_58 = arith.constant 0 : index
    %c81 = arith.constant 81 : index
    %104 = vector.load %arg11[%c0_58, %c81] : memref<1x358xf32, #tpu.memory_space<vmem>>, vector<1x256xf32>
    %105 = vector.broadcast %103 : f32 to vector<1x256xf32>
    %106 = arith.mulf %105, %104 : vector<1x256xf32>
    %107 = arith.addf %102, %106 : vector<1x256xf32>
    %c6_59 = arith.constant 6 : index
    %c1_60 = arith.constant 1 : index
    %108 = memref.load %arg4[%c6_59, %c1_60] : memref<7x7xf32, #tpu.memory_space<smem>>
    %c0_61 = arith.constant 0 : index
    %c97 = arith.constant 97 : index
    %109 = vector.load %arg11[%c0_61, %c97] : memref<1x358xf32, #tpu.memory_space<vmem>>, vector<1x256xf32>
    %110 = vector.broadcast %108 : f32 to vector<1x256xf32>
    %111 = arith.mulf %110, %109 : vector<1x256xf32>
    %112 = arith.addf %107, %111 : vector<1x256xf32>
    %c-2_i32 = arith.constant -2 : i32
    %113 = vector.broadcast %c-2_i32 : i32 to vector<1x256xi32>
    %114 = arith.addi %27, %113 : vector<1x256xi32>
    %c0_i32_62 = arith.constant 0 : i32
    %115 = vector.broadcast %c0_i32_62 : i32 to vector<1x256xi32>
    %116 = arith.cmpi sge, %114, %115 : vector<1x256xi32>
    %c-2_i32_63 = arith.constant -2 : i32
    %117 = vector.broadcast %c-2_i32_63 : i32 to vector<1x256xi32>
    %118 = arith.addi %27, %117 : vector<1x256xi32>
    %c16_i32_64 = arith.constant 16 : i32
    %119 = vector.broadcast %c16_i32_64 : i32 to vector<1x256xi32>
    %120 = arith.cmpi slt, %118, %119 : vector<1x256xi32>
    %121 = arith.andi %116, %120 : vector<1x256xi1>
    %cst_65 = arith.constant 0.000000e+00 : f32
    %122 = vector.broadcast %cst_65 : f32 to vector<1x256xf32>
    %123 = arith.select %121, %112, %122 : vector<1x256xi1>, vector<1x256xf32>
    %124 = arith.addf %76, %123 : vector<1x256xf32>
    %cst_66 = arith.constant 0.000000e+00 : f32
    %125 = vector.broadcast %cst_66 : f32 to vector<1x256xf32>
    %c0_67 = arith.constant 0 : index
    %c2_68 = arith.constant 2 : index
    %126 = memref.load %arg4[%c0_67, %c2_68] : memref<7x7xf32, #tpu.memory_space<smem>>
    %c0_69 = arith.constant 0 : index
    %c2_70 = arith.constant 2 : index
    %127 = vector.load %arg11[%c0_69, %c2_70] : memref<1x358xf32, #tpu.memory_space<vmem>>, vector<1x256xf32>
    %128 = vector.broadcast %126 : f32 to vector<1x256xf32>
    %129 = arith.mulf %128, %127 : vector<1x256xf32>
    %130 = arith.addf %125, %129 : vector<1x256xf32>
    %c1_71 = arith.constant 1 : index
    %c2_72 = arith.constant 2 : index
    %131 = memref.load %arg4[%c1_71, %c2_72] : memref<7x7xf32, #tpu.memory_space<smem>>
    %c0_73 = arith.constant 0 : index
    %c18 = arith.constant 18 : index
    %132 = vector.load %arg11[%c0_73, %c18] : memref<1x358xf32, #tpu.memory_space<vmem>>, vector<1x256xf32>
    %133 = vector.broadcast %131 : f32 to vector<1x256xf32>
    %134 = arith.mulf %133, %132 : vector<1x256xf32>
    %135 = arith.addf %130, %134 : vector<1x256xf32>
    %c2_74 = arith.constant 2 : index
    %c2_75 = arith.constant 2 : index
    %136 = memref.load %arg4[%c2_74, %c2_75] : memref<7x7xf32, #tpu.memory_space<smem>>
    %c0_76 = arith.constant 0 : index
    %c34 = arith.constant 34 : index
    %137 = vector.load %arg11[%c0_76, %c34] : memref<1x358xf32, #tpu.memory_space<vmem>>, vector<1x256xf32>
    %138 = vector.broadcast %136 : f32 to vector<1x256xf32>
    %139 = arith.mulf %138, %137 : vector<1x256xf32>
    %140 = arith.addf %135, %139 : vector<1x256xf32>
    %c3_77 = arith.constant 3 : index
    %c2_78 = arith.constant 2 : index
    %141 = memref.load %arg4[%c3_77, %c2_78] : memref<7x7xf32, #tpu.memory_space<smem>>
    %c0_79 = arith.constant 0 : index
    %c50 = arith.constant 50 : index
    %142 = vector.load %arg11[%c0_79, %c50] : memref<1x358xf32, #tpu.memory_space<vmem>>, vector<1x256xf32>
    %143 = vector.broadcast %141 : f32 to vector<1x256xf32>
    %144 = arith.mulf %143, %142 : vector<1x256xf32>
    %145 = arith.addf %140, %144 : vector<1x256xf32>
    %c4_80 = arith.constant 4 : index
    %c2_81 = arith.constant 2 : index
    %146 = memref.load %arg4[%c4_80, %c2_81] : memref<7x7xf32, #tpu.memory_space<smem>>
    %c0_82 = arith.constant 0 : index
    %c66 = arith.constant 66 : index
    %147 = vector.load %arg11[%c0_82, %c66] : memref<1x358xf32, #tpu.memory_space<vmem>>, vector<1x256xf32>
    %148 = vector.broadcast %146 : f32 to vector<1x256xf32>
    %149 = arith.mulf %148, %147 : vector<1x256xf32>
    %150 = arith.addf %145, %149 : vector<1x256xf32>
    %c5_83 = arith.constant 5 : index
    %c2_84 = arith.constant 2 : index
    %151 = memref.load %arg4[%c5_83, %c2_84] : memref<7x7xf32, #tpu.memory_space<smem>>
    %c0_85 = arith.constant 0 : index
    %c82 = arith.constant 82 : index
    %152 = vector.load %arg11[%c0_85, %c82] : memref<1x358xf32, #tpu.memory_space<vmem>>, vector<1x256xf32>
    %153 = vector.broadcast %151 : f32 to vector<1x256xf32>
    %154 = arith.mulf %153, %152 : vector<1x256xf32>
    %155 = arith.addf %150, %154 : vector<1x256xf32>
    %c6_86 = arith.constant 6 : index
    %c2_87 = arith.constant 2 : index
    %156 = memref.load %arg4[%c6_86, %c2_87] : memref<7x7xf32, #tpu.memory_space<smem>>
    %c0_88 = arith.constant 0 : index
    %c98 = arith.constant 98 : index
    %157 = vector.load %arg11[%c0_88, %c98] : memref<1x358xf32, #tpu.memory_space<vmem>>, vector<1x256xf32>
    %158 = vector.broadcast %156 : f32 to vector<1x256xf32>
    %159 = arith.mulf %158, %157 : vector<1x256xf32>
    %160 = arith.addf %155, %159 : vector<1x256xf32>
    %c-1_i32 = arith.constant -1 : i32
    %161 = vector.broadcast %c-1_i32 : i32 to vector<1x256xi32>
    %162 = arith.addi %27, %161 : vector<1x256xi32>
    %c0_i32_89 = arith.constant 0 : i32
    %163 = vector.broadcast %c0_i32_89 : i32 to vector<1x256xi32>
    %164 = arith.cmpi sge, %162, %163 : vector<1x256xi32>
    %c-1_i32_90 = arith.constant -1 : i32
    %165 = vector.broadcast %c-1_i32_90 : i32 to vector<1x256xi32>
    %166 = arith.addi %27, %165 : vector<1x256xi32>
    %c16_i32_91 = arith.constant 16 : i32
    %167 = vector.broadcast %c16_i32_91 : i32 to vector<1x256xi32>
    %168 = arith.cmpi slt, %166, %167 : vector<1x256xi32>
    %169 = arith.andi %164, %168 : vector<1x256xi1>
    %cst_92 = arith.constant 0.000000e+00 : f32
    %170 = vector.broadcast %cst_92 : f32 to vector<1x256xf32>
    %171 = arith.select %169, %160, %170 : vector<1x256xi1>, vector<1x256xf32>
    %172 = arith.addf %124, %171 : vector<1x256xf32>
    %cst_93 = arith.constant 0.000000e+00 : f32
    %173 = vector.broadcast %cst_93 : f32 to vector<1x256xf32>
    %c0_94 = arith.constant 0 : index
    %c3_95 = arith.constant 3 : index
    %174 = memref.load %arg4[%c0_94, %c3_95] : memref<7x7xf32, #tpu.memory_space<smem>>
    %c0_96 = arith.constant 0 : index
    %c3_97 = arith.constant 3 : index
    %175 = vector.load %arg11[%c0_96, %c3_97] : memref<1x358xf32, #tpu.memory_space<vmem>>, vector<1x256xf32>
    %176 = vector.broadcast %174 : f32 to vector<1x256xf32>
    %177 = arith.mulf %176, %175 : vector<1x256xf32>
    %178 = arith.addf %173, %177 : vector<1x256xf32>
    %c1_98 = arith.constant 1 : index
    %c3_99 = arith.constant 3 : index
    %179 = memref.load %arg4[%c1_98, %c3_99] : memref<7x7xf32, #tpu.memory_space<smem>>
    %c0_100 = arith.constant 0 : index
    %c19 = arith.constant 19 : index
    %180 = vector.load %arg11[%c0_100, %c19] : memref<1x358xf32, #tpu.memory_space<vmem>>, vector<1x256xf32>
    %181 = vector.broadcast %179 : f32 to vector<1x256xf32>
    %182 = arith.mulf %181, %180 : vector<1x256xf32>
    %183 = arith.addf %178, %182 : vector<1x256xf32>
    %c2_101 = arith.constant 2 : index
    %c3_102 = arith.constant 3 : index
    %184 = memref.load %arg4[%c2_101, %c3_102] : memref<7x7xf32, #tpu.memory_space<smem>>
    %c0_103 = arith.constant 0 : index
    %c35 = arith.constant 35 : index
    %185 = vector.load %arg11[%c0_103, %c35] : memref<1x358xf32, #tpu.memory_space<vmem>>, vector<1x256xf32>
    %186 = vector.broadcast %184 : f32 to vector<1x256xf32>
    %187 = arith.mulf %186, %185 : vector<1x256xf32>
    %188 = arith.addf %183, %187 : vector<1x256xf32>
    %c3_104 = arith.constant 3 : index
    %c3_105 = arith.constant 3 : index
    %189 = memref.load %arg4[%c3_104, %c3_105] : memref<7x7xf32, #tpu.memory_space<smem>>
    %c0_106 = arith.constant 0 : index
    %c51_107 = arith.constant 51 : index
    %190 = vector.load %arg11[%c0_106, %c51_107] : memref<1x358xf32, #tpu.memory_space<vmem>>, vector<1x256xf32>
    %191 = vector.broadcast %189 : f32 to vector<1x256xf32>
    %192 = arith.mulf %191, %190 : vector<1x256xf32>
    %193 = arith.addf %188, %192 : vector<1x256xf32>
    %c4_108 = arith.constant 4 : index
    %c3_109 = arith.constant 3 : index
    %194 = memref.load %arg4[%c4_108, %c3_109] : memref<7x7xf32, #tpu.memory_space<smem>>
    %c0_110 = arith.constant 0 : index
    %c67 = arith.constant 67 : index
    %195 = vector.load %arg11[%c0_110, %c67] : memref<1x358xf32, #tpu.memory_space<vmem>>, vector<1x256xf32>
    %196 = vector.broadcast %194 : f32 to vector<1x256xf32>
    %197 = arith.mulf %196, %195 : vector<1x256xf32>
    %198 = arith.addf %193, %197 : vector<1x256xf32>
    %c5_111 = arith.constant 5 : index
    %c3_112 = arith.constant 3 : index
    %199 = memref.load %arg4[%c5_111, %c3_112] : memref<7x7xf32, #tpu.memory_space<smem>>
    %c0_113 = arith.constant 0 : index
    %c83 = arith.constant 83 : index
    %200 = vector.load %arg11[%c0_113, %c83] : memref<1x358xf32, #tpu.memory_space<vmem>>, vector<1x256xf32>
    %201 = vector.broadcast %199 : f32 to vector<1x256xf32>
    %202 = arith.mulf %201, %200 : vector<1x256xf32>
    %203 = arith.addf %198, %202 : vector<1x256xf32>
    %c6_114 = arith.constant 6 : index
    %c3_115 = arith.constant 3 : index
    %204 = memref.load %arg4[%c6_114, %c3_115] : memref<7x7xf32, #tpu.memory_space<smem>>
    %c0_116 = arith.constant 0 : index
    %c99 = arith.constant 99 : index
    %205 = vector.load %arg11[%c0_116, %c99] : memref<1x358xf32, #tpu.memory_space<vmem>>, vector<1x256xf32>
    %206 = vector.broadcast %204 : f32 to vector<1x256xf32>
    %207 = arith.mulf %206, %205 : vector<1x256xf32>
    %208 = arith.addf %203, %207 : vector<1x256xf32>
    %209 = arith.addf %172, %208 : vector<1x256xf32>
    %cst_117 = arith.constant 0.000000e+00 : f32
    %210 = vector.broadcast %cst_117 : f32 to vector<1x256xf32>
    %c0_118 = arith.constant 0 : index
    %c4_119 = arith.constant 4 : index
    %211 = memref.load %arg4[%c0_118, %c4_119] : memref<7x7xf32, #tpu.memory_space<smem>>
    %c0_120 = arith.constant 0 : index
    %c4_121 = arith.constant 4 : index
    %212 = vector.load %arg11[%c0_120, %c4_121] : memref<1x358xf32, #tpu.memory_space<vmem>>, vector<1x256xf32>
    %213 = vector.broadcast %211 : f32 to vector<1x256xf32>
    %214 = arith.mulf %213, %212 : vector<1x256xf32>
    %215 = arith.addf %210, %214 : vector<1x256xf32>
    %c1_122 = arith.constant 1 : index
    %c4_123 = arith.constant 4 : index
    %216 = memref.load %arg4[%c1_122, %c4_123] : memref<7x7xf32, #tpu.memory_space<smem>>
    %c0_124 = arith.constant 0 : index
    %c20 = arith.constant 20 : index
    %217 = vector.load %arg11[%c0_124, %c20] : memref<1x358xf32, #tpu.memory_space<vmem>>, vector<1x256xf32>
    %218 = vector.broadcast %216 : f32 to vector<1x256xf32>
    %219 = arith.mulf %218, %217 : vector<1x256xf32>
    %220 = arith.addf %215, %219 : vector<1x256xf32>
    %c2_125 = arith.constant 2 : index
    %c4_126 = arith.constant 4 : index
    %221 = memref.load %arg4[%c2_125, %c4_126] : memref<7x7xf32, #tpu.memory_space<smem>>
    %c0_127 = arith.constant 0 : index
    %c36 = arith.constant 36 : index
    %222 = vector.load %arg11[%c0_127, %c36] : memref<1x358xf32, #tpu.memory_space<vmem>>, vector<1x256xf32>
    %223 = vector.broadcast %221 : f32 to vector<1x256xf32>
    %224 = arith.mulf %223, %222 : vector<1x256xf32>
    %225 = arith.addf %220, %224 : vector<1x256xf32>
    %c3_128 = arith.constant 3 : index
    %c4_129 = arith.constant 4 : index
    %226 = memref.load %arg4[%c3_128, %c4_129] : memref<7x7xf32, #tpu.memory_space<smem>>
    %c0_130 = arith.constant 0 : index
    %c52 = arith.constant 52 : index
    %227 = vector.load %arg11[%c0_130, %c52] : memref<1x358xf32, #tpu.memory_space<vmem>>, vector<1x256xf32>
    %228 = vector.broadcast %226 : f32 to vector<1x256xf32>
    %229 = arith.mulf %228, %227 : vector<1x256xf32>
    %230 = arith.addf %225, %229 : vector<1x256xf32>
    %c4_131 = arith.constant 4 : index
    %c4_132 = arith.constant 4 : index
    %231 = memref.load %arg4[%c4_131, %c4_132] : memref<7x7xf32, #tpu.memory_space<smem>>
    %c0_133 = arith.constant 0 : index
    %c68 = arith.constant 68 : index
    %232 = vector.load %arg11[%c0_133, %c68] : memref<1x358xf32, #tpu.memory_space<vmem>>, vector<1x256xf32>
    %233 = vector.broadcast %231 : f32 to vector<1x256xf32>
    %234 = arith.mulf %233, %232 : vector<1x256xf32>
    %235 = arith.addf %230, %234 : vector<1x256xf32>
    %c5_134 = arith.constant 5 : index
    %c4_135 = arith.constant 4 : index
    %236 = memref.load %arg4[%c5_134, %c4_135] : memref<7x7xf32, #tpu.memory_space<smem>>
    %c0_136 = arith.constant 0 : index
    %c84 = arith.constant 84 : index
    %237 = vector.load %arg11[%c0_136, %c84] : memref<1x358xf32, #tpu.memory_space<vmem>>, vector<1x256xf32>
    %238 = vector.broadcast %236 : f32 to vector<1x256xf32>
    %239 = arith.mulf %238, %237 : vector<1x256xf32>
    %240 = arith.addf %235, %239 : vector<1x256xf32>
    %c6_137 = arith.constant 6 : index
    %c4_138 = arith.constant 4 : index
    %241 = memref.load %arg4[%c6_137, %c4_138] : memref<7x7xf32, #tpu.memory_space<smem>>
    %c0_139 = arith.constant 0 : index
    %c100 = arith.constant 100 : index
    %242 = vector.load %arg11[%c0_139, %c100] : memref<1x358xf32, #tpu.memory_space<vmem>>, vector<1x256xf32>
    %243 = vector.broadcast %241 : f32 to vector<1x256xf32>
    %244 = arith.mulf %243, %242 : vector<1x256xf32>
    %245 = arith.addf %240, %244 : vector<1x256xf32>
    %c1_i32_140 = arith.constant 1 : i32
    %246 = vector.broadcast %c1_i32_140 : i32 to vector<1x256xi32>
    %247 = arith.addi %27, %246 : vector<1x256xi32>
    %c0_i32_141 = arith.constant 0 : i32
    %248 = vector.broadcast %c0_i32_141 : i32 to vector<1x256xi32>
    %249 = arith.cmpi sge, %247, %248 : vector<1x256xi32>
    %c1_i32_142 = arith.constant 1 : i32
    %250 = vector.broadcast %c1_i32_142 : i32 to vector<1x256xi32>
    %251 = arith.addi %27, %250 : vector<1x256xi32>
    %c16_i32_143 = arith.constant 16 : i32
    %252 = vector.broadcast %c16_i32_143 : i32 to vector<1x256xi32>
    %253 = arith.cmpi slt, %251, %252 : vector<1x256xi32>
    %254 = arith.andi %249, %253 : vector<1x256xi1>
    %cst_144 = arith.constant 0.000000e+00 : f32
    %255 = vector.broadcast %cst_144 : f32 to vector<1x256xf32>
    %256 = arith.select %254, %245, %255 : vector<1x256xi1>, vector<1x256xf32>
    %257 = arith.addf %209, %256 : vector<1x256xf32>
    %cst_145 = arith.constant 0.000000e+00 : f32
    %258 = vector.broadcast %cst_145 : f32 to vector<1x256xf32>
    %c0_146 = arith.constant 0 : index
    %c5_147 = arith.constant 5 : index
    %259 = memref.load %arg4[%c0_146, %c5_147] : memref<7x7xf32, #tpu.memory_space<smem>>
    %c0_148 = arith.constant 0 : index
    %c5_149 = arith.constant 5 : index
    %260 = vector.load %arg11[%c0_148, %c5_149] : memref<1x358xf32, #tpu.memory_space<vmem>>, vector<1x256xf32>
    %261 = vector.broadcast %259 : f32 to vector<1x256xf32>
    %262 = arith.mulf %261, %260 : vector<1x256xf32>
    %263 = arith.addf %258, %262 : vector<1x256xf32>
    %c1_150 = arith.constant 1 : index
    %c5_151 = arith.constant 5 : index
    %264 = memref.load %arg4[%c1_150, %c5_151] : memref<7x7xf32, #tpu.memory_space<smem>>
    %c0_152 = arith.constant 0 : index
    %c21 = arith.constant 21 : index
    %265 = vector.load %arg11[%c0_152, %c21] : memref<1x358xf32, #tpu.memory_space<vmem>>, vector<1x256xf32>
    %266 = vector.broadcast %264 : f32 to vector<1x256xf32>
    %267 = arith.mulf %266, %265 : vector<1x256xf32>
    %268 = arith.addf %263, %267 : vector<1x256xf32>
    %c2_153 = arith.constant 2 : index
    %c5_154 = arith.constant 5 : index
    %269 = memref.load %arg4[%c2_153, %c5_154] : memref<7x7xf32, #tpu.memory_space<smem>>
    %c0_155 = arith.constant 0 : index
    %c37 = arith.constant 37 : index
    %270 = vector.load %arg11[%c0_155, %c37] : memref<1x358xf32, #tpu.memory_space<vmem>>, vector<1x256xf32>
    %271 = vector.broadcast %269 : f32 to vector<1x256xf32>
    %272 = arith.mulf %271, %270 : vector<1x256xf32>
    %273 = arith.addf %268, %272 : vector<1x256xf32>
    %c3_156 = arith.constant 3 : index
    %c5_157 = arith.constant 5 : index
    %274 = memref.load %arg4[%c3_156, %c5_157] : memref<7x7xf32, #tpu.memory_space<smem>>
    %c0_158 = arith.constant 0 : index
    %c53 = arith.constant 53 : index
    %275 = vector.load %arg11[%c0_158, %c53] : memref<1x358xf32, #tpu.memory_space<vmem>>, vector<1x256xf32>
    %276 = vector.broadcast %274 : f32 to vector<1x256xf32>
    %277 = arith.mulf %276, %275 : vector<1x256xf32>
    %278 = arith.addf %273, %277 : vector<1x256xf32>
    %c4_159 = arith.constant 4 : index
    %c5_160 = arith.constant 5 : index
    %279 = memref.load %arg4[%c4_159, %c5_160] : memref<7x7xf32, #tpu.memory_space<smem>>
    %c0_161 = arith.constant 0 : index
    %c69 = arith.constant 69 : index
    %280 = vector.load %arg11[%c0_161, %c69] : memref<1x358xf32, #tpu.memory_space<vmem>>, vector<1x256xf32>
    %281 = vector.broadcast %279 : f32 to vector<1x256xf32>
    %282 = arith.mulf %281, %280 : vector<1x256xf32>
    %283 = arith.addf %278, %282 : vector<1x256xf32>
    %c5_162 = arith.constant 5 : index
    %c5_163 = arith.constant 5 : index
    %284 = memref.load %arg4[%c5_162, %c5_163] : memref<7x7xf32, #tpu.memory_space<smem>>
    %c0_164 = arith.constant 0 : index
    %c85 = arith.constant 85 : index
    %285 = vector.load %arg11[%c0_164, %c85] : memref<1x358xf32, #tpu.memory_space<vmem>>, vector<1x256xf32>
    %286 = vector.broadcast %284 : f32 to vector<1x256xf32>
    %287 = arith.mulf %286, %285 : vector<1x256xf32>
    %288 = arith.addf %283, %287 : vector<1x256xf32>
    %c6_165 = arith.constant 6 : index
    %c5_166 = arith.constant 5 : index
    %289 = memref.load %arg4[%c6_165, %c5_166] : memref<7x7xf32, #tpu.memory_space<smem>>
    %c0_167 = arith.constant 0 : index
    %c101 = arith.constant 101 : index
    %290 = vector.load %arg11[%c0_167, %c101] : memref<1x358xf32, #tpu.memory_space<vmem>>, vector<1x256xf32>
    %291 = vector.broadcast %289 : f32 to vector<1x256xf32>
    %292 = arith.mulf %291, %290 : vector<1x256xf32>
    %293 = arith.addf %288, %292 : vector<1x256xf32>
    %c2_i32 = arith.constant 2 : i32
    %294 = vector.broadcast %c2_i32 : i32 to vector<1x256xi32>
    %295 = arith.addi %27, %294 : vector<1x256xi32>
    %c0_i32_168 = arith.constant 0 : i32
    %296 = vector.broadcast %c0_i32_168 : i32 to vector<1x256xi32>
    %297 = arith.cmpi sge, %295, %296 : vector<1x256xi32>
    %c2_i32_169 = arith.constant 2 : i32
    %298 = vector.broadcast %c2_i32_169 : i32 to vector<1x256xi32>
    %299 = arith.addi %27, %298 : vector<1x256xi32>
    %c16_i32_170 = arith.constant 16 : i32
    %300 = vector.broadcast %c16_i32_170 : i32 to vector<1x256xi32>
    %301 = arith.cmpi slt, %299, %300 : vector<1x256xi32>
    %302 = arith.andi %297, %301 : vector<1x256xi1>
    %cst_171 = arith.constant 0.000000e+00 : f32
    %303 = vector.broadcast %cst_171 : f32 to vector<1x256xf32>
    %304 = arith.select %302, %293, %303 : vector<1x256xi1>, vector<1x256xf32>
    %305 = arith.addf %257, %304 : vector<1x256xf32>
    %cst_172 = arith.constant 0.000000e+00 : f32
    %306 = vector.broadcast %cst_172 : f32 to vector<1x256xf32>
    %c0_173 = arith.constant 0 : index
    %c6_174 = arith.constant 6 : index
    %307 = memref.load %arg4[%c0_173, %c6_174] : memref<7x7xf32, #tpu.memory_space<smem>>
    %c0_175 = arith.constant 0 : index
    %c6_176 = arith.constant 6 : index
    %308 = vector.load %arg11[%c0_175, %c6_176] : memref<1x358xf32, #tpu.memory_space<vmem>>, vector<1x256xf32>
    %309 = vector.broadcast %307 : f32 to vector<1x256xf32>
    %310 = arith.mulf %309, %308 : vector<1x256xf32>
    %311 = arith.addf %306, %310 : vector<1x256xf32>
    %c1_177 = arith.constant 1 : index
    %c6_178 = arith.constant 6 : index
    %312 = memref.load %arg4[%c1_177, %c6_178] : memref<7x7xf32, #tpu.memory_space<smem>>
    %c0_179 = arith.constant 0 : index
    %c22 = arith.constant 22 : index
    %313 = vector.load %arg11[%c0_179, %c22] : memref<1x358xf32, #tpu.memory_space<vmem>>, vector<1x256xf32>
    %314 = vector.broadcast %312 : f32 to vector<1x256xf32>
    %315 = arith.mulf %314, %313 : vector<1x256xf32>
    %316 = arith.addf %311, %315 : vector<1x256xf32>
    %c2_180 = arith.constant 2 : index
    %c6_181 = arith.constant 6 : index
    %317 = memref.load %arg4[%c2_180, %c6_181] : memref<7x7xf32, #tpu.memory_space<smem>>
    %c0_182 = arith.constant 0 : index
    %c38 = arith.constant 38 : index
    %318 = vector.load %arg11[%c0_182, %c38] : memref<1x358xf32, #tpu.memory_space<vmem>>, vector<1x256xf32>
    %319 = vector.broadcast %317 : f32 to vector<1x256xf32>
    %320 = arith.mulf %319, %318 : vector<1x256xf32>
    %321 = arith.addf %316, %320 : vector<1x256xf32>
    %c3_183 = arith.constant 3 : index
    %c6_184 = arith.constant 6 : index
    %322 = memref.load %arg4[%c3_183, %c6_184] : memref<7x7xf32, #tpu.memory_space<smem>>
    %c0_185 = arith.constant 0 : index
    %c54 = arith.constant 54 : index
    %323 = vector.load %arg11[%c0_185, %c54] : memref<1x358xf32, #tpu.memory_space<vmem>>, vector<1x256xf32>
    %324 = vector.broadcast %322 : f32 to vector<1x256xf32>
    %325 = arith.mulf %324, %323 : vector<1x256xf32>
    %326 = arith.addf %321, %325 : vector<1x256xf32>
    %c4_186 = arith.constant 4 : index
    %c6_187 = arith.constant 6 : index
    %327 = memref.load %arg4[%c4_186, %c6_187] : memref<7x7xf32, #tpu.memory_space<smem>>
    %c0_188 = arith.constant 0 : index
    %c70 = arith.constant 70 : index
    %328 = vector.load %arg11[%c0_188, %c70] : memref<1x358xf32, #tpu.memory_space<vmem>>, vector<1x256xf32>
    %329 = vector.broadcast %327 : f32 to vector<1x256xf32>
    %330 = arith.mulf %329, %328 : vector<1x256xf32>
    %331 = arith.addf %326, %330 : vector<1x256xf32>
    %c5_189 = arith.constant 5 : index
    %c6_190 = arith.constant 6 : index
    %332 = memref.load %arg4[%c5_189, %c6_190] : memref<7x7xf32, #tpu.memory_space<smem>>
    %c0_191 = arith.constant 0 : index
    %c86 = arith.constant 86 : index
    %333 = vector.load %arg11[%c0_191, %c86] : memref<1x358xf32, #tpu.memory_space<vmem>>, vector<1x256xf32>
    %334 = vector.broadcast %332 : f32 to vector<1x256xf32>
    %335 = arith.mulf %334, %333 : vector<1x256xf32>
    %336 = arith.addf %331, %335 : vector<1x256xf32>
    %c6_192 = arith.constant 6 : index
    %c6_193 = arith.constant 6 : index
    %337 = memref.load %arg4[%c6_192, %c6_193] : memref<7x7xf32, #tpu.memory_space<smem>>
    %c0_194 = arith.constant 0 : index
    %c102 = arith.constant 102 : index
    %338 = vector.load %arg11[%c0_194, %c102] : memref<1x358xf32, #tpu.memory_space<vmem>>, vector<1x256xf32>
    %339 = vector.broadcast %337 : f32 to vector<1x256xf32>
    %340 = arith.mulf %339, %338 : vector<1x256xf32>
    %341 = arith.addf %336, %340 : vector<1x256xf32>
    %c3_i32 = arith.constant 3 : i32
    %342 = vector.broadcast %c3_i32 : i32 to vector<1x256xi32>
    %343 = arith.addi %27, %342 : vector<1x256xi32>
    %c0_i32_195 = arith.constant 0 : i32
    %344 = vector.broadcast %c0_i32_195 : i32 to vector<1x256xi32>
    %345 = arith.cmpi sge, %343, %344 : vector<1x256xi32>
    %c3_i32_196 = arith.constant 3 : i32
    %346 = vector.broadcast %c3_i32_196 : i32 to vector<1x256xi32>
    %347 = arith.addi %27, %346 : vector<1x256xi32>
    %c16_i32_197 = arith.constant 16 : i32
    %348 = vector.broadcast %c16_i32_197 : i32 to vector<1x256xi32>
    %349 = arith.cmpi slt, %347, %348 : vector<1x256xi32>
    %350 = arith.andi %345, %349 : vector<1x256xi1>
    %cst_198 = arith.constant 0.000000e+00 : f32
    %351 = vector.broadcast %cst_198 : f32 to vector<1x256xf32>
    %352 = arith.select %350, %341, %351 : vector<1x256xi1>, vector<1x256xf32>
    %353 = arith.addf %305, %352 : vector<1x256xf32>
    %cst_199 = arith.constant 0.000000e+00 : f32
    %354 = vector.broadcast %cst_199 : f32 to vector<1x256xf32>
    %355 = arith.subf %354, %353 : vector<1x256xf32>
    %356 = math.exp %355 : vector<1x256xf32>
    %cst_200 = arith.constant 1.000000e+00 : f32
    %357 = vector.broadcast %cst_200 : f32 to vector<1x256xf32>
    %358 = arith.addf %357, %356 : vector<1x256xf32>
    %cst_201 = arith.constant 1.000000e+00 : f32
    %359 = vector.broadcast %cst_201 : f32 to vector<1x256xf32>
    %360 = arith.divf %359, %358 : vector<1x256xf32>
    %c0_202 = arith.constant 0 : index
    %361 = memref.load %arg5[%c0_202] : memref<2xf32, #tpu.memory_space<smem>>
    %362 = vector.broadcast %361 : f32 to vector<1x256xf32>
    %363 = arith.mulf %360, %362 : vector<1x256xf32>
    %c1_203 = arith.constant 1 : index
    %364 = memref.load %arg5[%c1_203] : memref<2xf32, #tpu.memory_space<smem>>
    %365 = vector.broadcast %364 : f32 to vector<1x256xf32>
    %366 = arith.addf %363, %365 : vector<1x256xf32>
    %367 = vector.shape_cast %366 : vector<1x256xf32> to vector<1x1x256xf32>
    %368 = vector.broadcast %367 : vector<1x1x256xf32> to vector<1x8x256xf32>
    %369 = arith.mulf %0, %368 : vector<1x8x256xf32>
    %370 = vector.broadcast %367 : vector<1x1x256xf32> to vector<1x8x256xf32>
    %371 = arith.mulf %1, %370 : vector<1x8x256xf32>
    %372 = vector.broadcast %367 : vector<1x1x256xf32> to vector<1x8x256xf32>
    %373 = arith.mulf %2, %372 : vector<1x8x256xf32>
    %c0_204 = arith.constant 0 : index
    %c0_205 = arith.constant 0 : index
    %374 = vector.load %arg6[%c0_204, %c0_205] : memref<24x1xf32, #tpu.memory_space<vmem>>, vector<24x1xf32>
    %c0_206 = arith.constant 0 : index
    %c0_207 = arith.constant 0 : index
    %375 = vector.load %arg7[%c0_206, %c0_207] : memref<24x1xf32, #tpu.memory_space<vmem>>, vector<24x1xf32>
    %cst_208 = arith.constant dense<0xFF800000> : vector<1x8xf32>
    %376 = vector.multi_reduction <maximumf>, %369, %cst_208 [2] : vector<1x8x256xf32> to vector<1x8xf32>
    %cst_209 = arith.constant dense<0xFF800000> : vector<1x8xf32>
    %377 = vector.multi_reduction <maximumf>, %371, %cst_209 [2] : vector<1x8x256xf32> to vector<1x8xf32>
    %cst_210 = arith.constant dense<0xFF800000> : vector<1x8xf32>
    %378 = vector.multi_reduction <maximumf>, %373, %cst_210 [2] : vector<1x8x256xf32> to vector<1x8xf32>
    %379 = vector.shape_cast %376 : vector<1x8xf32> to vector<1x8x1xf32>
    %380 = vector.extract_strided_slice %374 {offsets = [0, 0], sizes = [8, 1], strides = [1, 1]} : vector<24x1xf32> to vector<8x1xf32>
    %381 = vector.shape_cast %380 : vector<8x1xf32> to vector<1x8x1xf32>
    %382 = arith.mulf %379, %381 : vector<1x8x1xf32>
    %cst_211 = arith.constant dense<0.000000e+00> : vector<1x1xf32>
    %383 = vector.multi_reduction <add>, %382, %cst_211 [1] : vector<1x8x1xf32> to vector<1x1xf32>
    %384 = vector.shape_cast %377 : vector<1x8xf32> to vector<1x8x1xf32>
    %385 = vector.extract_strided_slice %374 {offsets = [8, 0], sizes = [8, 1], strides = [1, 1]} : vector<24x1xf32> to vector<8x1xf32>
    %386 = vector.shape_cast %385 : vector<8x1xf32> to vector<1x8x1xf32>
    %387 = arith.mulf %384, %386 : vector<1x8x1xf32>
    %cst_212 = arith.constant dense<0.000000e+00> : vector<1x1xf32>
    %388 = vector.multi_reduction <add>, %387, %cst_212 [1] : vector<1x8x1xf32> to vector<1x1xf32>
    %389 = arith.addf %383, %388 : vector<1x1xf32>
    %390 = vector.shape_cast %378 : vector<1x8xf32> to vector<1x8x1xf32>
    %391 = vector.extract_strided_slice %374 {offsets = [16, 0], sizes = [8, 1], strides = [1, 1]} : vector<24x1xf32> to vector<8x1xf32>
    %392 = vector.shape_cast %391 : vector<8x1xf32> to vector<1x8x1xf32>
    %393 = arith.mulf %390, %392 : vector<1x8x1xf32>
    %cst_213 = arith.constant dense<0.000000e+00> : vector<1x1xf32>
    %394 = vector.multi_reduction <add>, %393, %cst_213 [1] : vector<1x8x1xf32> to vector<1x1xf32>
    %395 = arith.addf %389, %394 : vector<1x1xf32>
    %cst_214 = arith.constant 0.000000e+00 : f32
    %396 = vector.broadcast %cst_214 : f32 to vector<1x1xf32>
    %397 = arith.maximumf %395, %396 : vector<1x1xf32>
    %398 = vector.shape_cast %397 : vector<1x1xf32> to vector<1x1x1xf32>
    %399 = vector.shape_cast %375 : vector<24x1xf32> to vector<1x24x1xf32>
    %400 = vector.broadcast %398 : vector<1x1x1xf32> to vector<1x24x1xf32>
    %401 = arith.mulf %400, %399 : vector<1x24x1xf32>
    %cst_215 = arith.constant dense<0.000000e+00> : vector<1x24xf32>
    %402 = vector.multi_reduction <add>, %401, %cst_215 [2] : vector<1x24x1xf32> to vector<1x24xf32>
    %cst_216 = arith.constant 0.000000e+00 : f32
    %403 = vector.broadcast %cst_216 : f32 to vector<1x24xf32>
    %404 = arith.subf %403, %402 : vector<1x24xf32>
    %405 = math.exp %404 : vector<1x24xf32>
    %cst_217 = arith.constant 1.000000e+00 : f32
    %406 = vector.broadcast %cst_217 : f32 to vector<1x24xf32>
    %407 = arith.addf %406, %405 : vector<1x24xf32>
    %cst_218 = arith.constant 1.000000e+00 : f32
    %408 = vector.broadcast %cst_218 : f32 to vector<1x24xf32>
    %409 = arith.divf %408, %407 : vector<1x24xf32>
    %c0_219 = arith.constant 0 : index
    %c0_220 = arith.constant 0 : index
    %410 = vector.load %arg8[%c0_219, %c0_220] : memref<16x24xf32, #tpu.memory_space<vmem>>, vector<16x24xf32>
    %411 = vector.extract_strided_slice %410 {offsets = [0, 0], sizes = [16, 8], strides = [1, 1]} : vector<16x24xf32> to vector<16x8xf32>
    %412 = vector.shape_cast %411 : vector<16x8xf32> to vector<1x16x8xf32>
    %413 = vector.extract_strided_slice %409 {offsets = [0, 0], sizes = [1, 8], strides = [1, 1]} : vector<1x24xf32> to vector<1x8xf32>
    %414 = vector.shape_cast %413 : vector<1x8xf32> to vector<1x1x8xf32>
    %415 = vector.broadcast %414 : vector<1x1x8xf32> to vector<1x16x8xf32>
    %416 = arith.mulf %412, %415 : vector<1x16x8xf32>
    %417 = vector.extract_strided_slice %410 {offsets = [0, 8], sizes = [16, 8], strides = [1, 1]} : vector<16x24xf32> to vector<16x8xf32>
    %418 = vector.shape_cast %417 : vector<16x8xf32> to vector<1x16x8xf32>
    %419 = vector.extract_strided_slice %409 {offsets = [0, 8], sizes = [1, 8], strides = [1, 1]} : vector<1x24xf32> to vector<1x8xf32>
    %420 = vector.shape_cast %419 : vector<1x8xf32> to vector<1x1x8xf32>
    %421 = vector.broadcast %420 : vector<1x1x8xf32> to vector<1x16x8xf32>
    %422 = arith.mulf %418, %421 : vector<1x16x8xf32>
    %423 = vector.extract_strided_slice %410 {offsets = [0, 16], sizes = [16, 8], strides = [1, 1]} : vector<16x24xf32> to vector<16x8xf32>
    %424 = vector.shape_cast %423 : vector<16x8xf32> to vector<1x16x8xf32>
    %425 = vector.extract_strided_slice %409 {offsets = [0, 16], sizes = [1, 8], strides = [1, 1]} : vector<1x24xf32> to vector<1x8xf32>
    %426 = vector.shape_cast %425 : vector<1x8xf32> to vector<1x1x8xf32>
    %427 = vector.broadcast %426 : vector<1x1x8xf32> to vector<1x16x8xf32>
    %428 = arith.mulf %424, %427 : vector<1x16x8xf32>
    "tpu.trace_start"() <{level = 10 : i32, message = "boc,bch->boh"}> : () -> ()
    %cst_221 = arith.constant dense<0.000000e+00> : vector<1x16x256xf32>
    %429 = tpu.matmul %416, %369, %cst_221 {dimension_numbers = #tpu.dot_dimension_numbers<[2], [1], [1], [2], [0, 0, 0, 1, 1, 2], [0], [0]>} : vector<1x16x8xf32>, vector<1x8x256xf32>, vector<1x16x256xf32> -> vector<1x16x256xf32>
    %cst_222 = arith.constant dense<0.000000e+00> : vector<1x16x256xf32>
    %430 = tpu.matmul %422, %371, %cst_222 {dimension_numbers = #tpu.dot_dimension_numbers<[2], [1], [1], [2], [0, 0, 0, 1, 1, 2], [0], [0]>} : vector<1x16x8xf32>, vector<1x8x256xf32>, vector<1x16x256xf32> -> vector<1x16x256xf32>
    "tpu.trace_stop"() : () -> ()
    %431 = arith.addf %429, %430 : vector<1x16x256xf32>
    "tpu.trace_start"() <{level = 10 : i32, message = "boc,bch->boh"}> : () -> ()
    %cst_223 = arith.constant dense<0.000000e+00> : vector<1x16x256xf32>
    %432 = tpu.matmul %428, %373, %cst_223 {dimension_numbers = #tpu.dot_dimension_numbers<[2], [1], [1], [2], [0, 0, 0, 1, 1, 2], [0], [0]>} : vector<1x16x8xf32>, vector<1x8x256xf32>, vector<1x16x256xf32> -> vector<1x16x256xf32>
    "tpu.trace_stop"() : () -> ()
    %433 = arith.addf %431, %432 : vector<1x16x256xf32>
    %c0_224 = arith.constant 0 : index
    %c0_225 = arith.constant 0 : index
    %434 = vector.load %arg9[%c0_224, %c0_225] : memref<16x1xf32, #tpu.memory_space<vmem>>, vector<16x1xf32>
    %435 = vector.shape_cast %434 : vector<16x1xf32> to vector<1x16x1xf32>
    %436 = vector.broadcast %435 : vector<1x16x1xf32> to vector<1x16x256xf32>
    %437 = arith.addf %433, %436 : vector<1x16x256xf32>
    %438 = vector.broadcast %367 : vector<1x1x256xf32> to vector<1x16x256xf32>
    %439 = arith.mulf %437, %438 : vector<1x16x256xf32>
    %c0_226 = arith.constant 0 : index
    %c0_227 = arith.constant 0 : index
    %c0_228 = arith.constant 0 : index
    %440 = vector.load %arg10[%c0_226, %c0_227, %c0_228] : memref<1x16x256xf32, #tpu.memory_space<vmem>>, vector<1x16x256xf32>
    tpu.vector_store %arg10[%c0_226, %c0_227, %c0_228], %439 {strides = array<i32>} : memref<1x16x256xf32, #tpu.memory_space<vmem>>, vector<1x16x256xf32>,
    return
  }
  func.func @transform_0(%arg0: i32) -> (i32, i32, i32) {
    %c0_i32 = arith.constant 0 : i32
    %c0_i32_0 = arith.constant 0 : i32
    %c0_i32_1 = arith.constant 0 : i32
    return %arg0, %c0_i32, %c0_i32_0 : i32, i32, i32
  }
  func.func @transform_1(%arg0: i32) -> (i32, i32, i32) {
    %c0_i32 = arith.constant 0 : i32
    %c0_i32_0 = arith.constant 0 : i32
    %c0_i32_1 = arith.constant 0 : i32
    return %arg0, %c0_i32, %c0_i32_0 : i32, i32, i32
  }
  func.func @transform_2(%arg0: i32) -> (i32, i32, i32) {
    %c0_i32 = arith.constant 0 : i32
    %c0_i32_0 = arith.constant 0 : i32
    %c0_i32_1 = arith.constant 0 : i32
    return %arg0, %c0_i32, %c0_i32_0 : i32, i32, i32
  }
  func.func @transform_3(%arg0: i32) -> (i32, i32) {
    %c0_i32 = arith.constant 0 : i32
    %c0_i32_0 = arith.constant 0 : i32
    %c0_i32_1 = arith.constant 0 : i32
    return %c0_i32, %c0_i32_0 : i32, i32
  }
  func.func @transform_4(%arg0: i32) -> i32 {
    %c0_i32 = arith.constant 0 : i32
    %c0_i32_0 = arith.constant 0 : i32
    return %c0_i32 : i32
  }
  func.func @transform_5(%arg0: i32) -> (i32, i32) {
    %c0_i32 = arith.constant 0 : i32
    %c0_i32_0 = arith.constant 0 : i32
    %c0_i32_1 = arith.constant 0 : i32
    return %c0_i32, %c0_i32_0 : i32, i32
  }
  func.func @transform_6(%arg0: i32) -> (i32, i32) {
    %c0_i32 = arith.constant 0 : i32
    %c0_i32_0 = arith.constant 0 : i32
    %c0_i32_1 = arith.constant 0 : i32
    return %c0_i32, %c0_i32_0 : i32, i32
  }
  func.func @transform_7(%arg0: i32) -> (i32, i32) {
    %c0_i32 = arith.constant 0 : i32
    %c0_i32_0 = arith.constant 0 : i32
    %c0_i32_1 = arith.constant 0 : i32
    return %c0_i32, %c0_i32_0 : i32, i32
  }
  func.func @transform_8(%arg0: i32) -> (i32, i32) {
    %c0_i32 = arith.constant 0 : i32
    %c0_i32_0 = arith.constant 0 : i32
    %c0_i32_1 = arith.constant 0 : i32
    return %c0_i32, %c0_i32_0 : i32, i32
  }
  func.func @transform_9(%arg0: i32) -> (i32, i32, i32) {
    %c0_i32 = arith.constant 0 : i32
    %c0_i32_0 = arith.constant 0 : i32
    %c0_i32_1 = arith.constant 0 : i32
    return %arg0, %c0_i32, %c0_i32_0 : i32, i32, i32
  }
}

</mosaic_0001>

<bundles_post_ra>
// kernel: mef_forward.1
= control target key start
LH: loop header
LB: loop body
LE: loop exit
PB: predicated region body
PF: predicated region fallthrough
CT: control target
= control target key end

     0   :  { %14 = vsyncpa [#allocation4], 0  ;;  %s2419_s0 = inlined_call_operand.vmem [shape: f32[2,8,256], index: 0, kind: input, shape index: {}]   ;;  %s2420_s1 = inlined_call_operand.vmem [shape: f32[2,8,256], index: 1, kind: input, shape index: {}]   ;;  %s2421_s2 = inlined_call_operand.vmem [shape: f32[2,8,256], index: 2, kind: input, shape index: {}]   ;;  %s2422_s3 = inlined_call_operand.vmem [shape: f32[7,7], index: 3, kind: input, shape index: {}]   ;;  %s2423_s4 = inlined_call_operand.vmem [shape: f32[2], index: 4, kind: input, shape index: {}]   ;;  %s2424_s5 = inlined_call_operand.vmem [shape: f32[24,1], index: 5, kind: input, shape index: {}]   ;;  %s2425_s6 = inlined_call_operand.vmem [shape: f32[24,1], index: 6, kind: input, shape index: {}]   ;;  %s2426_s7 = inlined_call_operand.vmem [shape: f32[16,24], index: 7, kind: input, shape index: {}]   ;;  %s2427_s8 = inlined_call_operand.vmem [shape: f32[16,1], index: 8, kind: input, shape index: {}]   ;;  %s2428_s9 = inlined_call_operand.vmem [shape: f32[2,16,256], index: 9, kind: output, shape index: {}]  }
   0x1   :  { %15 = vsyncpa [#allocation6], 0  ;;  %s2016_s30 = smov 0  }
   0x2 LB: > { %s2022_s10 = sadd.s32 4294967295, %s1945_s30   ;;  %p1741_p0 = scmp.ge.s32.totalorder %s1945_s30, 1  ;;  %s1945_s30 = sphi %s2016_s30, %s21_s30  }
   0x3   : > { %p256_p1 = scmp.lt.s32.totalorder %s1945_s30, 3  ;;  %s269_s13 = sshll.u32 %s2422_s3, 4  ;;  %s270_s13 = int_to_ptr.vmem [resolvable:$true] %s269_s13 }
   0x4   : > { %p2429_p3 = scmp.eq.s32.totalorder %s2022_s10, 0  ;;  %s280_s17 = sshll.u32 %s2423_s4, 4  ;;  %s281_s17 = int_to_ptr.vmem [resolvable:$true] %s280_s17 }
   0x5   : > { %p2029_p2 = pnand %p1741_p0, %p256_p1  ;;  %s1901_s19 = scalar_lea.vmem %s270_s13, 128 }
   0x6   : > { %p1902_p6 = scmp.ne.s32.totalorder %s270_s13, %s1901_s19  ;;  %p1909_p10 = scmp.lt.s32.totalorder %s270_s13, %s270_s13 }
   0x7   : > { %s2431_s14 = scalar_select %p2029_p2, 1, 0 }
   0x8   : > { %p1835_p4 = pneg %p2029_p2  ;;  %p1910_p11 = scmp.lt.s32.totalorder %s1901_s19, %s1901_s19 }
   0xa   : > { %p2041_p5 = pnand %p2429_p3, %p1835_p4  ;;  %p1911_p12 = por %p1910_p11, %p1909_p10 }
   0xc   : > { %p1903_p7 = pneg %p2041_p5 }
   0xe   : > { %p1904_p8 = pnand %p1903_p7, %p1902_p6 }
  0x10   : > { %p1905_p9 = pneg %p1904_p8 }
  0x12   : > { %p1912_p13 = pnand %p1911_p12, %p1905_p9 }
  0x14   : > { %1915 = shalt.err (!%p1912_p13)
}
  0x15   : > { %s1947_s20 = smov [#allocation3]   ;;  %s1916_s21 = scalar_lea.vmem %s281_s17, 16 }
  0x16   : > { %1838 = dma.vmem_to_smem (!%p2041_p5), %s270_s13, 128, %s1947_s20, [#allocation4]  }
  0x17   : > { %p1917_p0 = scmp.ne.s32.totalorder %s281_s17, %s1916_s21  ;;  %p1924_p3 = scmp.lt.s32.totalorder %s281_s17, %s281_s17 }
  0x18   : > { %p1925_p2 = scmp.lt.s32.totalorder %s1916_s21, %s1916_s21 }
  0x19   : > { %p1919_p1 = pnand %p1917_p0, %p1903_p7 }
  0x1a   : > { %p1926_p6 = por %p1925_p2, %p1924_p3 }
  0x1b   : > { %p1920_p4 = pneg %p1919_p1 }
  0x1d   : > { %p1927_p8 = pnand %p1926_p6, %p1920_p4 }
  0x1f   : > { %1930 = shalt.err (!%p1927_p8)
}
  0x20   : > { %s1948_s22 = smov [#allocation5]   ;;  %p2433_p9 = scmp.ne.s32.totalorder %s2431_s14, 0 }
  0x21   : > { %1841 = dma.vmem_to_smem (!%p2041_p5), %s281_s17, 16, %s1948_s22, [#allocation6]  }
  0x22   : > { %329 = sbr.rel (%p2433_p9) target bundleno = 1236 (0x4d4), region = 56  ;;  %p2434_p10 = scmp.eq.s32.totalorder (!%p2433_p9), %s2022_s10, 0 }
  0x29   : > { %1936 = dma.done.wait (%p2434_p10), [#allocation4], 128   ;;  %p2435_p11 = pmov %p2434_p10 }
  0x2a   : > { %p2436_p7 = pmov %p2434_p10 }
  0x2b   : > { %1938 = vsyncadd (%p2435_p11), [#allocation4], 4294967168 }
  0x2c   : > { %1940 = dma.done.wait (%p2436_p7), [#allocation6], 16   ;;  %p2437_p2 = pmov %p2436_p7 }
  0x2e   : > { %1942 = vsyncadd (%p2437_p2), [#allocation6], 4294967280 }
  0x2f   : > { %339 = sfence }
  0x30   : > { %p380_p3 = scmp.lt.s32.totalorder %s2022_s10, 1  ;;  %v446_v0 = vlaneseq  ;;  %v1949_v1 = vmov 0.0   ;;  %v1950_v32 = vmov 1966171168   ;;  %s1951_s14 = smov 51   ;;  %vm471_vm3 = vcmask 416768  }
  0x31   : > { %1510 = vmatprep.mubr.f32.mxu0 %v1949_v1  ;;  %1427 = vmatprep.mubr.f32.mxu1 %v1949_v1  ;;  %v455_v33 = vunpack.c.l.s4 %v1950_v32  ;;  %s1764_s15 = sld [smem:[#allocation3 + $0x101]]  ;;  %s1770_s17 = sld [smem:[#allocation3 + $0x82]]  ;;  %vm518_vm5 = vcmask 916480   ;;  %vm529_vm6 = vcmask 785408   ;;  %vm540_vm7 = vcmask 654336  }
  0x32   : > { %s2439_s10 = smov (!%p380_p3, %s2022_s10), 1  ;;  %vm448_vm0 = vcmp.lt.s32.totalorder %v446_v0, 358  ;;  %v2092_v43 = vshrl.u32 %v446_v0, 7  ;;  %vm474_vm1 = vcmp.ge.s32.totalorder %v446_v0, 51  ;;  %vm475_vm2 = vcmp.lt.s32.totalorder %v446_v0, 307  ;;  %s1763_s16 = sld [smem:[#allocation3 + $0x81]] }
  0x33   : > { %450 = vst.msk [vmem:[#allocation2] sm:$0x7] %vm448_vm0, %v1949_v1  ;;  %s1813_s23 = sshll.u32 %s2439_s10, 4  ;;  %v456_v47 = vunpack.c.0.s8 %v455_v33  ;;  %vm476_vm4 = vmand %vm474_vm1, %vm475_vm2  ;;  %s1765_s18 = sld [smem:[#allocation3 + $0x181]]  ;;  %vm551_vm8 = vcmask 523264   ;;  %vm562_vm9 = vcmask 392192  }
  0x34   : > { %s2073_s26 = scalar_lea.vmem %s2419_s0, %s1813_s23  ;;  %s2078_s29 = scalar_lea.vmem %s2420_s1, %s1813_s23  ;;  %vm573_vm10 = vcmask 261120   ;;  %vm691_vm11 = vcmask 1039360   ;;  %vm791_vm14 = vcmask 1031168  }
  0x35   : > { %s2083_s13 = scalar_lea.vmem %s2421_s2, %s1813_s23  ;;  %v400_v2 = vld [vmem:[%s2073_s26] sm:$0xff]  ;;  %v401_v3 = vld [vmem:[%s2073_s26 + $0x8] sm:$0xff]  ;;  %v459_v52 = vsub.s32 %v456_v47, %v2092_v43  ;;  %s1771_s19 = sld [smem:[#allocation3 + $0x102]] }
  0x36   : > { %v402_v4 = vld [vmem:[%s2078_s29] sm:$0xff]  ;;  %v403_v5 = vld [vmem:[%s2078_s29 + $0x8] sm:$0xff]  ;;  %v406_v8 = vrot.slane %v400_v2, 4  ;;  %v412_v9 = vrot.slane %v401_v3, 4  ;;  %s1777_s20 = sld [smem:[#allocation3 + $0x83]]  ;;  %s1766_s21 = sld [smem:[#allocation3 + $0x201]] }
  0x37   : > { %v404_v6 = vld [vmem:[%s2083_s13] sm:$0xff]  ;;  %v405_v7 = vld [vmem:[%s2083_s13 + $0x8] sm:$0xff]  ;;  %v418_v10 = vrot.slane %v402_v4, 4  ;;  %v424_v11 = vrot.slane %v403_v5, 4  ;;  %v615_v59 = vstv %s1764_s15  ;;  %s1772_s22 = sld [smem:[#allocation3 + $0x182]]  ;;  %s1952_s23 = smov 96  }
  0x38   : > { %v432_v12 = vrot.slane %v404_v6, 4  ;;  %v438_v13 = vrot.slane %v405_v7, 4  ;;  %v407_v14 = vmax.f32 %v400_v2, %v406_v8  ;;  %v413_v15 = vmax.f32 %v401_v3, %v412_v9  ;;  %s1953_s24 = smov 112   ;;  %s1784_s25 = sld [smem:[#allocation3 + $0x84]] }
  0x39   : > { %v419_v16 = vmax.f32 %v402_v4, %v418_v10  ;;  %v425_v17 = vmax.f32 %v403_v5, %v424_v11  ;;  %v605_v60 = vstv %s1763_s16  ;;  %v705_v2 = vstv %s1770_s17  ;;  %s1778_s27 = sld [smem:[#allocation3 + $0x103]]  ;;  %s1954_s28 = smov 80  }
  0x3a   : > { %v433_v18 = vmax.f32 %v404_v6, %v432_v12  ;;  %v439_v19 = vmax.f32 %v405_v7, %v438_v13  ;;  %v408_v20 = vrot.slane %v407_v14, 2  ;;  %v414_v21 = vrot.slane %v413_v15, 2  ;;  %s1767_s11 = sld [smem:[#allocation3 + $0x281]]  ;;  %s1773_s12 = sld [smem:[#allocation3 + $0x202]] }
  0x3b   : > { %v420_v22 = vrot.slane %v419_v16, 2  ;;  %v426_v23 = vrot.slane %v425_v17, 2  ;;  %v625_v3 = vstv %s1765_s18  ;;  %v715_v6 = vstv %s1771_s19  ;;  %s1791_s15 = sld [smem:[#allocation3 + $0x85]]  ;;  %s1955_s16 = smov 64  }
  0x3c   : > { %v434_v24 = vrot.slane %v433_v18, 2  ;;  %v440_v25 = vrot.slane %v439_v19, 2  ;;  %v409_v26 = vmax.f32 %v407_v14, %v408_v20  ;;  %v415_v27 = vmax.f32 %v413_v15, %v414_v21  ;;  %s1779_s17 = sld [smem:[#allocation3 + $0x183]]  ;;  %s1768_s18 = sld [smem:[#allocation3 + $0x301]] }
  0x3d   : > { %v421_v28 = vmax.f32 %v419_v16, %v420_v22  ;;  %v427_v29 = vmax.f32 %v425_v17, %v426_v23  ;;  %v805_v7 = vstv %s1777_s20  ;;  %v635_v10 = vstv %s1766_s21  ;;  %s1774_s19 = sld [smem:[#allocation3 + $0x282]]  ;;  %s1786_s20 = sld [smem:[#allocation3 + $0x184]] }
  0x3e   : > { %v435_v30 = vmax.f32 %v433_v18, %v434_v24  ;;  %v441_v31 = vmax.f32 %v439_v19, %v440_v25  ;;  %v410_v34 = vrot.slane %v409_v26, 1  ;;  %v416_v35 = vrot.slane %v415_v27, 1  ;;  %s1956_s21 = smov 48  }
  0x3f   : > { %v422_v36 = vrot.slane %v421_v28, 1  ;;  %v428_v37 = vrot.slane %v427_v29, 1  ;;  %v725_v11 = vstv %s1772_s22  ;;  %v895_v14 = vstv %s1784_s25  ;;  %s1792_s22 = sld [smem:[#allocation3 + $0x105]]  ;;  %s1798_s25 = sld [smem:[#allocation3 + $0x86]] }
  0x40   : > { %v436_v38 = vrot.slane %v435_v30, 1  ;;  %v442_v39 = vrot.slane %v441_v31, 1  ;;  %v411_v40 = vmax.f32 %v409_v26, %v410_v34  ;;  %v417_v41 = vmax.f32 %v415_v27, %v416_v35 }
  0x41   : > { %v423_v42 = vmax.f32 %v421_v28, %v422_v36  ;;  %v429_v44 = vmax.f32 %v427_v29, %v428_v37  ;;  %v815_v15 = vstv %s1778_s27  ;;  %v645_v18 = vstv %s1767_s11  ;;  %s1780_s27 = sld [smem:[#allocation3 + $0x203]]  ;;  %s1775_s11 = sld [smem:[#allocation3 + $0x302]] }
  0x42   : > { %v437_v45 = vmax.f32 %v435_v30, %v436_v38  ;;  %v443_v46 = vmax.f32 %v441_v31, %v442_v39  ;;  %v735_v19 = vstv %s1773_s12  ;;  %v995_v23 = vstv %s1791_s15  ;;  %s1957_s12 = smov 32   ;;  %s1793_s15 = sld [smem:[#allocation3 + $0x185]] }
  0x43   : > { %v430_v48 = vmax.f32 %v411_v40, %v423_v42  ;;  %v431_v49 = vmax.f32 %v417_v41, %v429_v44  ;;  %v825_v26 = vstv %s1779_s17  ;;  %v655_v27 = vstv %s1768_s18  ;;  %s1799_s17 = sld [smem:[#allocation3 + $0x106]]  ;;  %s1781_s18 = sld [smem:[#allocation3 + $0x283]] }
  0x44   : > { %v745_v30 = vstv %s1774_s19  ;;  %v915_v31 = vstv %s1786_s20  ;;  %s1788_s19 = sld [smem:[#allocation3 + $0x284]]  ;;  %s1794_s20 = sld [smem:[#allocation3 + $0x205]] }
  0x45   : > { %v444_v50 = vmax.f32 %v430_v48, %v437_v45  ;;  %v445_v51 = vmax.f32 %v431_v49, %v443_v46  ;;  %v1005_v34 = vstv %s1792_s22  ;;  %v1095_v35 = vstv %s1798_s25  ;;  %s1800_s22 = sld [smem:[#allocation3 + $0x186]]  ;;  %s1782_s25 = sld [smem:[#allocation3 + $0x303]] }
  0x47   : > { %v453_v53 = vcombine.low %v444_v50, %v445_v51  ;;  %v835_v38 = vstv %s1780_s27  ;;  %v755_v39 = vstv %s1775_s11  ;;  %s1789_s27 = sld [smem:[#allocation3 + $0x304]]  ;;  %s1795_s11 = sld [smem:[#allocation3 + $0x285]] }
  0x48   : > { %v1015_v44 = vstv %s1793_s15  ;;  %s1796_s15 = sld [smem:[#allocation3 + $0x305]] }
  0x49   : > { %v460_v54 = vrot.slane %v453_v53, %v459_v52  ;;  %v1105_v47 = vstv %s1799_s17  ;;  %v845_v48 = vstv %s1781_s18  ;;  %s1802_s17 = sld [smem:[#allocation3 + $0x286]] }
  0x4a   : > { %v935_v51 = vstv %s1788_s19  ;;  %s1803_s18 = sld [smem:[#allocation3 + $0x306]]  ;;  %s1757_s19 = sld [smem:[#allocation3 + $0x100]] }
  0x4b   : > { %v467_v55 = vrot.slane %v460_v54, %v459_v52  ;;  %v1025_v52 = vstv %s1794_s20  ;;  %s1756_s20 = sld [smem:[#allocation3 + $0x80]] }
  0x4d   : > { %468 = vrot.lane.b32.xlu0 %v467_v55, %s1951_s14  ;;  %s1785_s14 = sld [smem:[#allocation3 + $0x104]]  ;;  %v1115_v55 = vstv %s1800_s22  ;;  %s1759_s22 = sld [smem:[#allocation3 + $0x200]] }
  0x53   : > { %v905_v22 = vstv %s1785_s14  ;;  %s1787_s14 = sld [smem:[#allocation3 + $0x204]] }
  0x59   : > { %v925_v42 = vstv %s1787_s14  ;;  %s1801_s14 = sld [smem:[#allocation3 + $0x206]] }
  0xbf   : > { %v469_v56 = vpop.permute.xlu0 %468 }
  0xc0   : > { %v470_v57 = vrot.slane %v469_v56, 7 }
  0xc2   : > { %v472_v58 = vsel %vm471_vm3, %v470_v57, %v469_v56  ;;  %v855_v56 = vstv %s1782_s25  ;;  %s1758_s25 = sld [smem:[#allocation3 + $0x180]]  ;;  %vm883_vm3 = vcmask 1022976  }
  0xc3   : > { %477 = vst.msk [vmem:[#allocation2] sm:$0x7] %vm476_vm4, %v472_v58  ;;  %vm981_vm4 = vcmask 1014784  }
  0xca   : > { %v2097_v61 = vld [vmem:[#allocation2] sm:$0x7] }
  0xcb   : > { %v616_v62 = vmul.f32 %v615_v59, %v2097_v61  ;;  %v606_v63 = vmul.f32 %v605_v60, %v2097_v61  ;;  %v706_v4 = vmul.f32 %v705_v2, %v2097_v61  ;;  %v626_v5 = vmul.f32 %v625_v3, %v2097_v61 }
  0xcc   : > { %v716_v8 = vmul.f32 %v715_v6, %v2097_v61  ;;  %v806_v9 = vmul.f32 %v805_v7, %v2097_v61  ;;  %v636_v12 = vmul.f32 %v635_v10, %v2097_v61  ;;  %v726_v13 = vmul.f32 %v725_v11, %v2097_v61 }
  0xcd   : > { %618 = vrot.lane.b32.xlu1 %v616_v62, %s1952_s23  ;;  %608 = vrot.lane.b32.xlu0 %v606_v63, %s1953_s24  ;;  %v896_v16 = vmul.f32 %v895_v14, %v2097_v61  ;;  %v816_v17 = vmul.f32 %v815_v15, %v2097_v61  ;;  %v646_v20 = vmul.f32 %v645_v18, %v2097_v61  ;;  %v945_v59 = vstv %s1789_s27  ;;  %s1761_s27 = sld [smem:[#allocation3 + $0x300]] }
  0xce   : > { %v736_v21 = vmul.f32 %v735_v19, %v2097_v61  ;;  %v906_v24 = vmul.f32 %v905_v22, %v2097_v61  ;;  %v996_v25 = vmul.f32 %v995_v23, %v2097_v61  ;;  %v826_v28 = vmul.f32 %v825_v26, %v2097_v61 }
  0xcf   : > { %v656_v29 = vmul.f32 %v655_v27, %v2097_v61  ;;  %v746_v32 = vmul.f32 %v745_v30, %v2097_v61  ;;  %v916_v33 = vmul.f32 %v915_v31, %v2097_v61  ;;  %v1006_v36 = vmul.f32 %v1005_v34, %v2097_v61 }
  0xd0   : > { %v1096_v37 = vmul.f32 %v1095_v35, %v2097_v61  ;;  %v836_v40 = vmul.f32 %v835_v38, %v2097_v61  ;;  %v756_v41 = vmul.f32 %v755_v39, %v2097_v61  ;;  %v926_v45 = vmul.f32 %v925_v42, %v2097_v61 }
  0xd1   : > { %708 = vrot.lane.b32.xlu1 %v706_v4, %s1953_s24  ;;  %628 = vrot.lane.b32.xlu0 %v626_v5, %s1954_s28  ;;  %v1016_v46 = vmul.f32 %v1015_v44, %v2097_v61  ;;  %v1106_v49 = vmul.f32 %v1105_v47, %v2097_v61  ;;  %v846_v50 = vmul.f32 %v845_v48, %v2097_v61  ;;  %v1035_v60 = vstv %s1795_s11  ;;  %s1760_s11 = sld [smem:[#allocation3 + $0x280]] }
  0xd2   : > { %v936_v53 = vmul.f32 %v935_v51, %v2097_v61  ;;  %v1026_v54 = vmul.f32 %v1025_v52, %v2097_v61  ;;  %v1116_v57 = vmul.f32 %v1115_v55, %v2097_v61  ;;  %v856_v58 = vmul.f32 %v855_v56, %v2097_v61 }
  0xd3   : > { %v946_v62 = vmul.f32 %v945_v59, %v2097_v61  ;;  %v1036_v63 = vmul.f32 %v1035_v60, %v2097_v61  ;;  %v1125_v2 = vstv %s1801_s14  ;;  %v1045_v3 = vstv %s1796_s15  ;;  %s2230_s14 = sld [smem:[#allocation3 + $0x5]]  ;;  %s2241_s15 = sld [smem:[#allocation3 + $0x6]] }
  0xd4   : > { %v1126_v4 = vmul.f32 %v1125_v2, %v2097_v61  ;;  %v1046_v5 = vmul.f32 %v1045_v3, %v2097_v61  ;;  %v1135_v6 = vstv %s1802_s17  ;;  %v1145_v7 = vstv %s1803_s18  ;;  %s1959_s17 = smov 126   ;;  %s2289_s18 = sld [smem:[#allocation3]] }
  0xd5   : > { %718 = vrot.lane.b32.xlu1 %v716_v8, %s1952_s23  ;;  %808 = vrot.lane.b32.xlu0 %v806_v9, %s1953_s24  ;;  %v1136_v8 = vmul.f32 %v1135_v6, %v2097_v61  ;;  %v1146_v9 = vmul.f32 %v1145_v7, %v2097_v61  ;;  %v523_v10 = vstv %s1757_s19  ;;  %v512_v11 = vstv %s1756_s20  ;;  %s1960_s19 = smov 125   ;;  %s1961_s20 = smov 124  }
  0xd6   : > { %v545_v14 = vstv %s1759_s22  ;;  %v534_v15 = vstv %s1758_s25  ;;  %v567_v18 = vstv %s1761_s27  ;;  %v2202_v60 = vsub.s32 1, %v2092_v43  ;;  %s1962_s22 = smov 123   ;;  %s1963_s25 = smov 122  }
  0xd7   : > { %v556_v19 = vstv %s1760_s11  ;;  %s1202_s27 = sld [smem:[#allocation5]]  ;;  %s1804_s11 = sld [smem:[#allocation5 + $0x1]] }
  0xd9   : > { %638 = vrot.lane.b32.xlu1 %v636_v12, %s1955_s16  ;;  %728 = vrot.lane.b32.xlu0 %v726_v13, %s1954_s28  ;;  %v524_v12 = vmul.f32 %v523_v10, %v2097_v61  ;;  %v513_v13 = vmul.f32 %v512_v11, %v2097_v61 }
  0xdd   : > { %898 = vrot.lane.b32.xlu1 %v896_v16, %s1953_s24  ;;  %818 = vrot.lane.b32.xlu0 %v816_v17, %s1952_s23  ;;  %v546_v16 = vmul.f32 %v545_v14, %v2097_v61  ;;  %v535_v17 = vmul.f32 %v534_v15, %v2097_v61 }
  0xe1   : > { %648 = vrot.lane.b32.xlu1 %v646_v20, %s1956_s21  ;;  %738 = vrot.lane.b32.xlu0 %v736_v21, %s1955_s16  ;;  %v568_v20 = vmul.f32 %v567_v18, %v2097_v61  ;;  %v557_v21 = vmul.f32 %v556_v19, %v2097_v61 }
  0xe5   : > { %908 = vrot.lane.b32.xlu1 %v906_v24, %s1952_s23  ;;  %998 = vrot.lane.b32.xlu0 %v996_v25, %s1953_s24 }
  0xe9   : > { %828 = vrot.lane.b32.xlu1 %v826_v28, %s1954_s28  ;;  %658 = vrot.lane.b32.xlu0 %v656_v29, %s1957_s12 }
  0xed   : > { %748 = vrot.lane.b32.xlu1 %v746_v32, %s1956_s21  ;;  %918 = vrot.lane.b32.xlu0 %v916_v33, %s1954_s28 }
  0xf1   : > { %1008 = vrot.lane.b32.xlu1 %v1006_v36, %s1952_s23  ;;  %1098 = vrot.lane.b32.xlu0 %v1096_v37, %s1953_s24 }
  0xf5   : > { %838 = vrot.lane.b32.xlu1 %v836_v40, %s1955_s16  ;;  %758 = vrot.lane.b32.xlu0 %v756_v41, %s1957_s12 }
  0xf9   : > { %928 = vrot.lane.b32.xlu1 %v926_v45, %s1955_s16  ;;  %1018 = vrot.lane.b32.xlu0 %v1016_v46, %s1954_s28 }
  0xfd   : > { %1108 = vrot.lane.b32.xlu1 %v1106_v49, %s1952_s23  ;;  %848 = vrot.lane.b32.xlu0 %v846_v50, %s1956_s21 }
 0x101   : > { %938 = vrot.lane.b32.xlu1 %v936_v53, %s1956_s21  ;;  %1028 = vrot.lane.b32.xlu0 %v1026_v54, %s1955_s16 }
 0x105   : > { %1118 = vrot.lane.b32.xlu1 %v1116_v57, %s1954_s28  ;;  %858 = vrot.lane.b32.xlu0 %v856_v58, %s1957_s12 }
 0x109   : > { %948 = vrot.lane.b32.xlu1 %v946_v62, %s1957_s12  ;;  %1038 = vrot.lane.b32.xlu0 %v1036_v63, %s1956_s21  ;;  %v2205_v62 = vsub.s32 0, %v2092_v43 }
 0x10d   : > { %1128 = vrot.lane.b32.xlu1 %v1126_v4, %s1955_s16  ;;  %1048 = vrot.lane.b32.xlu0 %v1046_v5, %s1957_s12 }
 0x111   : > { %1138 = vrot.lane.b32.xlu1 %v1136_v8, %s1956_s21  ;;  %1148 = vrot.lane.b32.xlu0 %v1146_v9, %s1957_s12 }
 0x115   : > { %526 = vrot.lane.b32.xlu0 %v524_v12, %s1952_s23  ;;  %515 = vrot.lane.b32.xlu1 %v513_v13, %s1953_s24  ;;  %s1762_s23 = sld [smem:[#allocation3 + $0x1]]  ;;  %v2216_v13 = vsub.s32 2, %v2092_v43 }
 0x119   : > { %548 = vrot.lane.b32.xlu0 %v546_v16, %s1955_s16  ;;  %537 = vrot.lane.b32.xlu1 %v535_v17, %s1954_s28  ;;  %s1769_s28 = sld [smem:[#allocation3 + $0x2]]  ;;  %s1958_s16 = smov 127  }
 0x11b   : > { %v601_v31 = vstv %s1762_s23 }
 0x11c   : > { %v602_v33 = vmul.f32 %v601_v31, %v2097_v61 }
 0x11d   : > { %570 = vrot.lane.b32.xlu0 %v568_v20, %s1957_s12  ;;  %559 = vrot.lane.b32.xlu1 %v557_v21, %s1956_s21  ;;  %s1776_s21 = sld [smem:[#allocation3 + $0x3]]  ;;  %s2226_s12 = sld [smem:[#allocation3 + $0x4]] }
 0x11f   : > { %v701_v56 = vstv %s1769_s28 }
 0x120   : > { %v702_v4 = vmul.f32 %v701_v56, %v2097_v61 }
 0x13f   : > { %v619_v22 = vpop.permute.xlu1 %618  ;;  %v609_v23 = vpop.permute.xlu0 %608 }
 0x140   : > { %v610_v28 = vrot.slane %v609_v23, 1  ;;  %v620_v36 = vrot.slane %v619_v22, 1 }
 0x142   : > { %v611_v32 = vsel %vm518_vm5, %v609_v23, %v610_v28  ;;  %v621_v41 = vsel %vm529_vm6, %v619_v22, %v620_v36  ;;  %v801_v36 = vstv %s1776_s21 }
 0x143   : > { %v709_v24 = vpop.permute.xlu1 %708  ;;  %v629_v25 = vpop.permute.xlu0 %628  ;;  %v613_v37 = vadd.f32 %v611_v32, %v602_v33 }
 0x144   : > { %v630_v38 = vrot.slane %v629_v25, 1  ;;  %v710_v51 = vrot.slane %v709_v24, 1 }
 0x145   : > { %v623_v44 = vadd.f32 %v621_v41, %v613_v37 }
 0x146   : > { %v631_v45 = vsel %vm540_vm7, %v629_v25, %v630_v38  ;;  %v711_v63 = vsel %vm518_vm5, %v709_v24, %v710_v51 }
 0x147   : > { %v719_v26 = vpop.permute.xlu1 %718  ;;  %v2183_v27 = vpop.permute.xlu0 %808  ;;  %v633_v50 = vadd.f32 %v631_v45, %v623_v44  ;;  %v713_v10 = vadd.f32 %v711_v63, %v702_v4  ;;  %v802_v44 = vmul.f32 %v801_v36, %v2097_v61 }
 0x148   : > { %v720_v57 = vrot.slane %v719_v26, 1 }
 0x14a   : > { %v721_v8 = vsel %vm529_vm6, %v719_v26, %v720_v57 }
 0x14b   : > { %v639_v29 = vpop.permute.xlu1 %638  ;;  %v729_v30 = vpop.permute.xlu0 %728  ;;  %v723_v16 = vadd.f32 %v721_v8, %v713_v10 }
 0x14c   : > { %v640_v42 = vrot.slane %v639_v29, 1  ;;  %v730_v2 = vrot.slane %v729_v30, 1 }
 0x14e   : > { %v641_v49 = vsel %vm551_vm8, %v639_v29, %v640_v42  ;;  %v731_v14 = vsel %vm540_vm7, %v729_v30, %v730_v2  ;;  %v810_v29 = vrot.slane %v2183_v27, 1 }
 0x14f   : > { %v2187_v34 = vpop.permute.xlu1 %898  ;;  %v2189_v35 = vpop.permute.xlu0 %818  ;;  %v643_v53 = vadd.f32 %v641_v49, %v633_v50  ;;  %v733_v20 = vadd.f32 %v731_v14, %v723_v16  ;;  %v891_v49 = vstv %s2226_s12 }
 0x150   : > { %v820_v37 = vrot.slane %v2189_v35, 1  ;;  %v900_v41 = vrot.slane %v2187_v34, 1 }
 0x152   : > { %v821_v50 = vsel %vm529_vm6, %v2189_v35, %v820_v37  ;;  %v991_v35 = vstv %s2230_s14 }
 0x153   : > { %v649_v39 = vpop.permute.xlu1 %648  ;;  %v739_v40 = vpop.permute.xlu0 %738  ;;  %v992_v16 = vmul.f32 %v991_v35, %v2097_v61 }
 0x154   : > { %v650_v46 = vrot.slane %v649_v39, 1  ;;  %v740_v9 = vrot.slane %v739_v40, 1 }
 0x156   : > { %v651_v52 = vsel %vm562_vm9, %v649_v39, %v650_v46  ;;  %v741_v19 = vsel %vm551_vm8, %v739_v40, %v740_v9  ;;  %v811_v40 = vsel %vm518_vm5, %v2183_v27, %v810_v29 }
 0x157   : > { %v2193_v47 = vpop.permute.xlu1 %908  ;;  %v2195_v48 = vpop.permute.xlu0 %998  ;;  %v653_v59 = vadd.f32 %v651_v52, %v643_v53  ;;  %v743_v23 = vadd.f32 %v741_v19, %v733_v20  ;;  %v813_v52 = vadd.f32 %v811_v40, %v802_v44 }
 0x158   : > { %v910_v27 = vrot.slane %v2193_v47, 1 }
 0x159   : > { %v823_v63 = vadd.f32 %v821_v50, %v813_v52 }
 0x15a   : > { %v911_v4 = vsel %vm529_vm6, %v2193_v47, %v910_v27 }
 0x15b   : > { %v2199_v54 = vpop.permute.xlu1 %828  ;;  %v659_v55 = vpop.permute.xlu0 %658 }
 0x15c   : > { %v660_v58 = vrot.slane %v659_v55, 1  ;;  %v830_v42 = vrot.slane %v2199_v54, 1 }
 0x15e   : > { %v661_v3 = vsel %vm573_vm10, %v659_v55, %v660_v58  ;;  %v901_v55 = vsel %vm518_vm5, %v2187_v34, %v900_v41  ;;  %v831_v56 = vsel %vm540_vm7, %v2199_v54, %v830_v42 }
 0x15f   : > { %v663_v5 = vadd.f32 %v661_v3, %v653_v59  ;;  %v749_v6 = vpop.permute.xlu1 %748  ;;  %v2210_v7 = vpop.permute.xlu0 %918  ;;  %v892_v59 = vmul.f32 %v891_v49, %v2097_v61  ;;  %v833_v8 = vadd.f32 %v831_v56, %v823_v63 }
 0x160   : > { %v750_v15 = vrot.slane %v749_v6, 1  ;;  %v920_v57 = vrot.slane %v2210_v7, 1 }
 0x161   : > { %v680_v11 = vrot.slane %v663_v5, %v2202_v60  ;;  %v676_v12 = vrot.slane %v663_v5, %v2205_v62  ;;  %v684_v21 = vrot.slane %v663_v5, %v2216_v13  ;;  %v1000_v5 = vrot.slane %v2195_v48, 1 }
 0x162   : > { %v751_v22 = vsel %vm562_vm9, %v749_v6, %v750_v15  ;;  %v903_v54 = vadd.f32 %v901_v55, %v892_v59  ;;  %v921_v10 = vsel %vm540_vm7, %v2210_v7, %v920_v57 }
 0x163   : > { %v2219_v17 = vpop.permute.xlu1 %1008  ;;  %v2221_v18 = vpop.permute.xlu0 %1098  ;;  %687 = vrot.lane.b32.xlu0 %v680_v11, %s1958_s16  ;;  %685 = vrot.lane.b32.xlu1 %v676_v12, %s1958_s16  ;;  %v753_v28 = vadd.f32 %v751_v22, %v743_v23  ;;  %v1091_v11 = vstv %s2241_s15  ;;  %v1001_v22 = vsel %vm518_vm5, %v2195_v48, %v1000_v5 }
 0x164   : > { %v1010_v9 = vrot.slane %v2219_v17, 1  ;;  %v913_v15 = vadd.f32 %v911_v4, %v903_v54  ;;  %v1100_v47 = vrot.slane %v2221_v18, 1  ;;  %v1003_v48 = vadd.f32 %v1001_v22, %v992_v16 }
 0x167   : > { %v839_v24 = vpop.permute.xlu1 %838  ;;  %v759_v25 = vpop.permute.xlu0 %758  ;;  %689 = vrot.lane.b32.xlu1 %v684_v21, %s1958_s16 }
 0x168   : > { %v760_v26 = vrot.slane %v759_v25, 1  ;;  %v840_v51 = vrot.slane %v839_v24, 1 }
 0x16a   : > { %v761_v30 = vsel %vm573_vm10, %v759_v25, %v760_v26  ;;  %v841_v34 = vsel %vm551_vm8, %v839_v24, %v840_v51  ;;  %v923_v25 = vadd.f32 %v921_v10, %v913_v15  ;;  %v1011_v26 = vsel %vm529_vm6, %v2219_v17, %v1010_v9 }
 0x16b   : > { %v763_v31 = vadd.f32 %v761_v30, %v753_v28  ;;  %v929_v32 = vpop.permute.xlu1 %928  ;;  %v2232_v33 = vpop.permute.xlu0 %1018  ;;  %v843_v19 = vadd.f32 %v841_v34, %v833_v8  ;;  %v1092_v28 = vmul.f32 %v1091_v11, %v2097_v61 }
 0x16c   : > { %v930_v6 = vrot.slane %v929_v32, 1  ;;  %v1020_v24 = vrot.slane %v2232_v33, 1 }
 0x16d   : > { %v776_v38 = vrot.slane %v763_v31, %v2205_v62  ;;  %v780_v39 = vrot.slane %v763_v31, %v2202_v60  ;;  %v784_v53 = vrot.slane %v763_v31, %v2216_v13 }
 0x16e   : > { %v931_v23 = vsel %vm551_vm8, %v929_v32, %v930_v6  ;;  %v1101_v32 = vsel %vm518_vm5, %v2221_v18, %v1100_v47  ;;  %v1021_v17 = vsel %vm540_vm7, %v2232_v33, %v1020_v24 }
 0x16f   : > { %v2244_v45 = vpop.permute.xlu1 %1108  ;;  %v849_v46 = vpop.permute.xlu0 %848  ;;  %785 = vrot.lane.b32.xlu0 %v776_v38, %s1959_s17  ;;  %787 = vrot.lane.b32.xlu1 %v780_v39, %s1959_s17  ;;  %v933_v38 = vadd.f32 %v931_v23, %v923_v25 }
 0x170   : > { %v850_v58 = vrot.slane %v849_v46, 1  ;;  %v1110_v30 = vrot.slane %v2244_v45, 1 }
 0x172   : > { %v851_v12 = vsel %vm562_vm9, %v849_v46, %v850_v58  ;;  %v1013_v46 = vadd.f32 %v1011_v26, %v1003_v48  ;;  %v1111_v51 = vsel %vm529_vm6, %v2244_v45, %v1110_v30 }
 0x173   : > { %v939_v2 = vpop.permute.xlu1 %938  ;;  %v1029_v3 = vpop.permute.xlu0 %1028  ;;  %789 = vrot.lane.b32.xlu0 %v784_v53, %s1959_s17  ;;  %v853_v29 = vadd.f32 %v851_v12, %v843_v19  ;;  %v1103_v53 = vadd.f32 %v1101_v32, %v1092_v28  ;;  %v507_v19 = vstv %s2289_s18 }
 0x174   : > { %v940_v14 = vrot.slane %v939_v2, 1  ;;  %v1030_v36 = vrot.slane %v1029_v3, 1  ;;  %v1023_v33 = vadd.f32 %v1021_v17, %v1013_v46 }
 0x175   : > { %v1113_v35 = vadd.f32 %v1111_v51, %v1103_v53 }
 0x176   : > { %v941_v31 = vsel %vm562_vm9, %v939_v2, %v940_v14  ;;  %v1031_v18 = vsel %vm551_vm8, %v1029_v3, %v1030_v36 }
 0x177   : > { %v1119_v20 = vpop.permute.xlu1 %1118  ;;  %v859_v21 = vpop.permute.xlu0 %858  ;;  %v943_v49 = vadd.f32 %v941_v31, %v933_v38  ;;  %v1033_v2 = vadd.f32 %v1031_v18, %v1023_v33 }
 0x178   : > { %v860_v7 = vrot.slane %v859_v21, 1  ;;  %v1120_v61 = vrot.slane %v1119_v20, 1 }
 0x17a   : > { %v861_v37 = vsel %vm573_vm10, %v859_v21, %v860_v7  ;;  %v1121_v58 = vsel %vm540_vm7, %v1119_v20, %v1120_v61  ;;  %v506_v20 = vld [vmem:[#allocation2] sm:$0x3] }
 0x17b   : > { %v863_v39 = vadd.f32 %v861_v37, %v853_v29  ;;  %v949_v40 = vpop.permute.xlu1 %948  ;;  %v1039_v41 = vpop.permute.xlu0 %1038  ;;  %v1123_v6 = vadd.f32 %v1121_v58, %v1113_v35  ;;  %v508_v28 = vmul.f32 %v507_v19, %v506_v20 }
 0x17c   : > { %v950_v42 = vrot.slane %v949_v40, 1  ;;  %v1040_v44 = vrot.slane %v1039_v41, 1 }
 0x17d   : > { %v872_v50 = vrot.slane %v863_v39, %v2202_v60  ;;  %v868_v27 = vrot.slane %v863_v39, %v2205_v62  ;;  %v876_v4 = vrot.slane %v863_v39, %v2216_v13 }
 0x17e   : > { %v951_v52 = vsel %vm573_vm10, %v949_v40, %v950_v42  ;;  %v1041_v59 = vsel %vm562_vm9, %v1039_v41, %v1040_v44 }
 0x17f   : > { %v953_v55 = vadd.f32 %v951_v52, %v943_v49  ;;  %v1129_v56 = vpop.permute.xlu1 %1128  ;;  %v1049_v57 = vpop.permute.xlu0 %1048  ;;  %879 = vrot.lane.b32.xlu0 %v872_v50, %s1960_s19  ;;  %877 = vrot.lane.b32.xlu1 %v868_v27, %s1960_s19  ;;  %v1043_v54 = vadd.f32 %v1041_v59, %v1033_v2 }
 0x180   : > { %v1130_v63 = vrot.slane %v1129_v56, 1  ;;  %v1050_v45 = vrot.slane %v1049_v57, 1 }
 0x181   : > { %v966_v3 = vrot.slane %v953_v55, %v2205_v62  ;;  %v974_v15 = vrot.slane %v953_v55, %v2216_v13  ;;  %v970_v16 = vrot.slane %v953_v55, %v2202_v60 }
 0x182   : > { %v1131_v5 = vsel %vm551_vm8, %v1129_v56, %v1130_v63  ;;  %v1051_v34 = vsel %vm573_vm10, %v1049_v57, %v1050_v45  ;;  %v2316_v45 = vand.u32 127, %v446_v0 }
 0x183   : > { %v1139_v8 = vpop.permute.xlu1 %1138  ;;  %v1149_v9 = vpop.permute.xlu0 %1148  ;;  %975 = vrot.lane.b32.xlu0 %v966_v3, %s1961_s20  ;;  %881 = vrot.lane.b32.xlu1 %v876_v4, %s1960_s19  ;;  %v1133_v12 = vadd.f32 %v1131_v5, %v1123_v6  ;;  %v1053_v14 = vadd.f32 %v1051_v34, %v1043_v54 }
 0x184   : > { %v1140_v10 = vrot.slane %v1139_v8, 1  ;;  %v1150_v11 = vrot.slane %v1149_v9, 1  ;;  %v485_v4 = vand.u32 15, %v2316_v45 }
 0x185   : > { %v1070_v29 = vrot.slane %v1053_v14, %v2202_v60  ;;  %v1066_v30 = vrot.slane %v1053_v14, %v2205_v62  ;;  %v1074_v17 = vrot.slane %v1053_v14, %v2216_v13 }
 0x186   : > { %v1141_v47 = vsel %vm562_vm9, %v1139_v8, %v1140_v10  ;;  %v1151_v24 = vsel %vm573_vm10, %v1149_v9, %v1150_v11  ;;  %v664_v54 = vadd.s32 4294967294, %v485_v4  ;;  %v577_v9 = vadd.s32 4294967293, %v485_v4 }
 0x187   : > { %v1143_v21 = vadd.f32 %v1141_v47, %v1133_v12  ;;  %979 = vrot.lane.b32.xlu0 %v974_v15, %s1961_s20  ;;  %v527_v22 = vpop.permute.xlu0 %526  ;;  %977 = vrot.lane.b32.xlu1 %v970_v16, %s1961_s20  ;;  %v516_v23 = vpop.permute.xlu1 %515  ;;  %v764_v10 = vadd.s32 4294967295, %v485_v4  ;;  %v954_v14 = vadd.s32 1, %v485_v4  ;;  %v1054_v19 = vadd.s32 2, %v485_v4 }
 0x188   : > { %v528_v7 = vrot.slane %v527_v22, 1  ;;  %v517_v25 = vrot.slane %v516_v23, 1  ;;  %vm666_vm12 = vcmp.ge.s32.totalorder %v664_v54, 0  ;;  %vm579_vm15 = vcmp.ge.s32.totalorder %v577_v9, 0 }
 0x189   : > { %v1153_v26 = vadd.f32 %v1151_v24, %v1143_v21  ;;  %vm766_vm1 = vcmp.ge.s32.totalorder %v764_v10, 0 }
 0x18a   : > { %v519_v31 = vsel %vm518_vm5, %v516_v23, %v517_v25  ;;  %v530_v32 = vsel %vm529_vm6, %v527_v22, %v528_v7  ;;  %vm958_vm5 = vcmp.lt.s32.totalorder %v954_v14, 16 }
 0x18b   : > { %v521_v36 = vadd.f32 %v519_v31, %v508_v28  ;;  %1077 = vrot.lane.b32.xlu0 %v1070_v29, %s1962_s22  ;;  %v549_v37 = vpop.permute.xlu0 %548  ;;  %1075 = vrot.lane.b32.xlu1 %v1066_v30, %s1962_s22  ;;  %v538_v48 = vpop.permute.xlu1 %537  ;;  %v1166_v41 = vrot.slane %v1153_v26, %v2205_v62  ;;  %v1174_v18 = vrot.slane %v1153_v26, %v2216_v13  ;;  %v480_v13 = vadd.s32 128, %v2316_v45 }
 0x18c   : > { %v550_v38 = vrot.slane %v549_v37, 1  ;;  %v539_v39 = vrot.slane %v538_v48, 1  ;;  %v1170_v52 = vrot.slane %v1153_v26, %v2202_v60 }
 0x18d   : > { %v532_v40 = vadd.f32 %v530_v32, %v521_v36  ;;  %v492_v5 = vand.u32 15, %v480_v13 }
 0x18e   : > { %v541_v61 = vsel %vm540_vm7, %v538_v48, %v539_v39  ;;  %v552_v49 = vsel %vm551_vm8, %v549_v37, %v550_v38  ;;  %vm1058_vm7 = vcmp.lt.s32.totalorder %v1054_v19, 16  ;;  %vm1081_vm8 = vcmask 1006592  }
 0x18f   : > { %v543_v42 = vadd.f32 %v541_v61, %v532_v40  ;;  %1175 = vrot.lane.b32.xlu0 %v1166_v41, %s1963_s25  ;;  %v571_v44 = vpop.permute.xlu0 %570  ;;  %1079 = vrot.lane.b32.xlu1 %v1074_v17, %s1962_s22  ;;  %v560_v46 = vpop.permute.xlu1 %559  ;;  %v665_v8 = vadd.s32 4294967294, %v492_v5  ;;  %v765_v0 = vadd.s32 4294967295, %v492_v5  ;;  %v955_v47 = vadd.s32 1, %v492_v5 }
 0x190   : > { %v572_v50 = vrot.slane %v571_v44, 1  ;;  %v561_v27 = vrot.slane %v560_v46, 1  ;;  %v1055_v26 = vadd.s32 2, %v492_v5  ;;  %v1154_v17 = vadd.s32 3, %v485_v4 }
 0x191   : > { %v554_v51 = vadd.f32 %v552_v49, %v543_v42  ;;  %vm667_vm13 = vcmp.ge.s32.totalorder %v665_v8, 0  ;;  %vm767_vm2 = vcmp.ge.s32.totalorder %v765_v0, 0  ;;  %vm959_vm6 = vcmp.lt.s32.totalorder %v955_v47, 16 }
 0x192   : > { %v563_v53 = vsel %vm562_vm9, %v560_v46, %v561_v27  ;;  %v574_v55 = vsel %vm573_vm10, %v571_v44, %v572_v50  ;;  %vm1059_vm9 = vcmp.lt.s32.totalorder %v1055_v26, 16  ;;  %v1155_v46 = vadd.s32 3, %v492_v5 }
 0x193   : > { %v565_v33 = vadd.f32 %v563_v53, %v554_v51  ;;  %1179 = vrot.lane.b32.xlu0 %v1174_v18, %s1963_s25  ;;  %1177 = vrot.lane.b32.xlu1 %v1170_v52, %s1963_s25  ;;  %vm1181_vm10 = vcmask 998400   ;;  %v1203_v0 = vstv %s1202_s27  ;;  %s1965_s27 = smov 120  }
 0x195   : > { %v576_v56 = vadd.f32 %v574_v55, %v565_v33 }
 0x197   : > { %v593_v57 = vrot.slane %v576_v56, %v2202_v60  ;;  %v578_v60 = vadd.s32 4294967293, %v492_v5  ;;  %v589_v20 = vrot.slane %v576_v56, %v2205_v62 }
 0x199   : > { %vm580_vm0 = vcmp.ge.s32.totalorder %v578_v60, 0  ;;  %v596_v28 = vsel %vm579_vm15, %v589_v20, 0.0 }
 0x19a   : > { %v597_v29 = vsel %vm580_vm0, %v593_v57, 0.0 }
 0x1d5   : > { %v688_v58 = vpop.permute.xlu0 %687  ;;  %v686_v59 = vpop.permute.xlu1 %685 }
 0x1d6   : > { %v692_v15 = vsel %vm691_vm11, %v686_v59, %v688_v58 }
 0x1d7   : > { %v696_v7 = vsel %vm666_vm12, %v692_v15, 0.0  ;;  %vm1159_vm12 = vcmp.lt.s32.totalorder %v1155_v46, 16  ;;  %v1207_v15 = vstv %s1804_s11 }
 0x1d8   : > { %v698_v48 = vadd.f32 %v696_v7, %v596_v28  ;;  %v1897_v28 = vld [vmem:[%s2078_s29 + $0x8] sm:$0xff] }
 0x1d9   : > { %v690_v35 = vpop.permute.xlu1 %689 }
 0x1da   : > { %v693_v16 = vsel %vm691_vm11, %v688_v58, %v690_v35  ;;  %vm1158_vm11 = vcmp.lt.s32.totalorder %v1154_v17, 16  ;;  %v1224_v17 = vld [vmem:[%s2424_s5] sm:$0xff] }
 0x1db   : > { %v697_v25 = vsel %vm667_vm13, %v693_v16, 0.0  ;;  %vm1240_vm13 = vcmask 7168  }
 0x1dc   : > { %v699_v32 = vadd.f32 %v697_v25, %v597_v29  ;;  %v1896_v25 = vld [vmem:[%s2073_s26] sm:$0xff] }
 0x1e1   : > { %v786_v63 = vpop.permute.xlu0 %785  ;;  %v788_v2 = vpop.permute.xlu1 %787 }
 0x1e2   : > { %v792_v23 = vsel %vm791_vm14, %v786_v63, %v788_v2 }
 0x1e3   : > { %v796_v30 = vsel %vm766_vm1, %v792_v23, 0.0 }
 0x1e4   : > { %v798_v61 = vadd.f32 %v796_v30, %v698_v48  ;;  %v1898_v30 = vld [vmem:[%s2073_s26 + $0x8] sm:$0xff] }
 0x1e5   : > { %v790_v3 = vpop.permute.xlu0 %789  ;;  %v1900_v48 = vld [vmem:[%s2083_s13 + $0x8] sm:$0xff] }
 0x1e6   : > { %v793_v24 = vsel %vm791_vm14, %v788_v2, %v790_v3  ;;  %vm1358_vm14 = vcmask 64512  }
 0x1e7   : > { %v797_v31 = vsel %vm767_vm2, %v793_v24, 0.0  ;;  %v1895_v24 = vld [vmem:[%s2078_s29] sm:$0xff] }
 0x1e8   : > { %v799_v42 = vadd.f32 %v797_v31, %v699_v32 }
 0x1f1   : > { %v880_v34 = vpop.permute.xlu0 %879  ;;  %v878_v6 = vpop.permute.xlu1 %877 }
 0x1f2   : > { %v884_v40 = vsel %vm883_vm3, %v878_v6, %v880_v34 }
 0x1f3   : > { %v888_v18 = vadd.f32 %v884_v40, %v798_v61  ;;  %v1964_v40 = vmov 0  }
 0x1f4   : > { %1874 = vset.pattern.permute.xlu0 %v1964_v40  ;;  %1873 = vset.pattern.permute.xlu1 %v1964_v40  ;;  %v1338_v40 = vadd.s32 4294967280, %v2316_v45 }
 0x1f5   : > { %v976_v11 = vpop.permute.xlu0 %975  ;;  %v882_v12 = vpop.permute.xlu1 %881 }
 0x1f6   : > { %v885_v41 = vsel %vm883_vm3, %v880_v34, %v882_v12 }
 0x1f7   : > { %v889_v52 = vadd.f32 %v885_v41, %v799_v42  ;;  %v1225_v41 = vld [vmem:[%s2424_s5 + $0x8] sm:$0xff] }
 0x1f9   : > { %v980_v21 = vpop.permute.xlu0 %979  ;;  %v978_v22 = vpop.permute.xlu1 %977 }
 0x1fa   : > { %v982_v38 = vsel %vm981_vm4, %v976_v11, %v978_v22  ;;  %v983_v39 = vsel %vm981_vm4, %v978_v22, %v980_v21 }
 0x1fb   : > { %v986_v49 = vsel %vm958_vm5, %v982_v38, 0.0  ;;  %v987_v50 = vsel %vm959_vm6, %v983_v39, 0.0 }
 0x1fc   : > { %v988_v56 = vadd.f32 %v986_v49, %v888_v18  ;;  %v989_v57 = vadd.f32 %v987_v50, %v889_v52  ;;  %v1226_v49 = vld [vmem:[%s2424_s5 + $0x10] sm:$0xff] }
 0x1fd   : > { %v1078_v36 = vpop.permute.xlu0 %1077  ;;  %v1076_v37 = vpop.permute.xlu1 %1075 }
 0x1fe   : > { %v1082_v44 = vsel %vm1081_vm8, %v1076_v37, %v1078_v36 }
 0x1ff   : > { %v1086_v33 = vsel %vm1058_vm7, %v1082_v44, 0.0 }
 0x200   : > { %v1088_v63 = vadd.f32 %v1086_v33, %v988_v56 }
 0x201   : > { %v1176_v27 = vpop.permute.xlu0 %1175  ;;  %v1080_v51 = vpop.permute.xlu1 %1079 }
 0x202   : > { %v1083_v53 = vsel %vm1081_vm8, %v1078_v36, %v1080_v51  ;;  %v1899_v36 = vld [vmem:[%s2083_s13] sm:$0xff] }
 0x203   : > { %v1087_v55 = vsel %vm1059_vm9, %v1083_v53, 0.0 }
 0x204   : > { %v1089_v35 = vadd.f32 %v1087_v55, %v989_v57 }
 0x205   : > { %v1180_v58 = vpop.permute.xlu0 %1179  ;;  %v1178_v59 = vpop.permute.xlu1 %1177 }
 0x206   : > { %v1182_v13 = vsel %vm1181_vm10, %v1176_v27, %v1178_v59  ;;  %v1183_v2 = vsel %vm1181_vm10, %v1178_v59, %v1180_v58 }
 0x207   : > { %v1186_v3 = vsel %vm1158_vm11, %v1182_v13, 0.0  ;;  %v1187_v4 = vsel %vm1159_vm12, %v1183_v2, 0.0 }
 0x208   : > { %v1188_v5 = vadd.f32 %v1186_v3, %v1088_v63  ;;  %v1189_v34 = vadd.f32 %v1187_v4, %v1089_v35 }
 0x20a   : > { %v1190_v6 = vsub.f32 0.0, %v1188_v5  ;;  %v1191_v54 = vsub.f32 0.0, %v1189_v34 }
 0x20c   : > { %v1192_v8 = vmul.f32 1.442695, %v1190_v6  ;;  %v1194_v9 = vmul.f32 1.442695, %v1191_v54 }
 0x20e   : > { %1875 = vpow2.f32 %v1192_v8 }
 0x20f   : > { %1877 = vpow2.f32 %v1194_v9 }
 0x218   : > { %v1876_v60 = vpop.eup %1875 }
 0x219   : > { %v1878_v10 = vpop.eup %1877  ;;  %v1196_v11 = vadd.f32 1.0, %v1876_v60 }
 0x21a   : > { %v1197_v12 = vadd.f32 1.0, %v1878_v10  ;;  %v1227_v10 = vld [vmem:[%s2425_s6] sm:$0xff] }
 0x21b   : > { %1879 = vrcp.f32 %v1196_v11  ;;  %v1228_v11 = vld [vmem:[%s2425_s6 + $0x8] sm:$0xff] }
 0x21c   : > { %1881 = vrcp.f32 %v1197_v12  ;;  %v1229_v12 = vld [vmem:[%s2425_s6 + $0x10] sm:$0xff] }
 0x225   : > { %v1880_v14 = vpop.eup %1879 }
 0x226   : > { %v1882_v16 = vpop.eup %1881  ;;  %v1204_v47 = vmul.f32 %v1880_v14, %v1203_v0 }
 0x227   : > { %v1205_v19 = vmul.f32 %v1882_v16, %v1203_v0 }
 0x228   : > { %v1208_v20 = vadd.f32 %v1207_v15, %v1204_v47 }
 0x229   : > { %v1209_v21 = vadd.f32 %v1207_v15, %v1205_v19 }
 0x22a   : > { %v2334_v22 = vrot.slane %v1208_v20, %v2205_v62 }
 0x22b   : > { %v2337_v23 = vrot.slane %v1209_v21, %v2205_v62 }
 0x22c   : > { %v1220_v7 = vmul.f32 %v1895_v24, %v2334_v22  ;;  %v2343_v26 = vmul.f32 %v1896_v25, %v2334_v22  ;;  %v2351_v37 = vmul.f32 %v1899_v36, %v2334_v22 }
 0x22d   : > { %v1221_v29 = vmul.f32 %v1897_v28, %v2337_v23  ;;  %v1219_v31 = vmul.f32 %v1898_v30, %v2337_v23  ;;  %v1223_v32 = vmul.f32 %v1900_v48, %v2337_v23 }
 0x22f   : > { %1363 = vmatprep.subr.mxu1 %v1221_v29  ;;  %1446 = vmatprep.subr.mxu0 %v1219_v31  ;;  %v1233_v62 = vmax.f32 %v1220_v7, %v1221_v29  ;;  %v1230_v38 = vmax.f32 %v2343_v26, %v1219_v31  ;;  %v1236_v39 = vmax.f32 %v2351_v37, %v1223_v32 }
 0x230   : > { %1364 = vmatpush1.msra.mxu1 %v1220_v7  ;;  %1447 = vmatpush1.msra.mxu0 %v2343_v26 }
 0x231   : > { %1817 = vmatprep.subr.mxu1 %v1219_v31  ;;  %1234 = vmax.xlane.f32.xlu0 %v1233_v62 }
 0x232   : > { %1533 = vmatprep.subr.mxu0 %v1223_v32  ;;  %1231 = vmax.xlane.f32.xlu1 %v1230_v38  ;;  %v1320_v38 = vadd.s32 4294967288, %v2316_v45 }
 0x235   : > { %1237 = vmax.xlane.f32.xlu0 %v1236_v39  ;;  %v1323_v39 = vsub.s32 %v1320_v38, %v2092_v43 }
 0x2be   : > { %v1235_v61 = vpop.xlane.xlu0 %1234 }
 0x2bf   : > { %v1248_v42 = vmul.f32 %v1235_v61, %v1225_v41  ;;  %v1232_v44 = vpop.xlane.xlu1 %1231  ;;  %v1291_v41 = vld [vmem:[%s2426_s7] sm:$0xff] }
 0x2c0   : > { %v1239_v46 = vmul.f32 %v1232_v44, %v1224_v17  ;;  %v1341_v44 = vsub.s32 %v1338_v40, %v2092_v43 }
 0x2c1   : > { %v1249_v50 = vsel %vm1240_vm13, %v1248_v42, 0.0  ;;  %v1299_v42 = vsub.s32 %v2316_v45, %v2092_v43 }
 0x2c2   : > { %v1250_v27 = vrot.slane %v1249_v50, 4  ;;  %v1241_v51 = vsel %vm1240_vm13, %v1239_v46, 0.0  ;;  %v1238_v18 = vpop.xlane.xlu0 %1237 }
 0x2c3   : > { %v1242_v52 = vrot.slane %v1241_v51, 4  ;;  %v1257_v53 = vmul.f32 %v1238_v18, %v1226_v49  ;;  %v1292_v49 = vld [vmem:[%s2426_s7 + $0x8] sm:$0xff] }
 0x2c4   : > { %v1251_v33 = vadd.f32 %v1250_v27, %v1249_v50 }
 0x2c5   : > { %v1243_v55 = vadd.f32 %v1242_v52, %v1241_v51  ;;  %v1258_v56 = vsel %vm1240_vm13, %v1257_v53, 0.0 }
 0x2c6   : > { %v1252_v57 = vrot.slane %v1251_v33, 2  ;;  %v1259_v58 = vrot.slane %v1258_v56, 4 }
 0x2c7   : > { %v1244_v59 = vrot.slane %v1243_v55, 2 }
 0x2c8   : > { %v1253_v63 = vadd.f32 %v1252_v57, %v1251_v33  ;;  %v1260_v35 = vadd.f32 %v1259_v58, %v1258_v56  ;;  %v1615_v56 = vld [vmem:[%s2427_s8 + $0x8] sm:$0xff] }
 0x2c9   : > { %v1245_v13 = vadd.f32 %v1244_v59, %v1243_v55  ;;  %v1614_v55 = vld [vmem:[%s2427_s8] sm:$0xff] }
 0x2ca   : > { %v1254_v2 = vrot.slane %v1253_v63, 1  ;;  %v1261_v3 = vrot.slane %v1260_v35, 2 }
 0x2cb   : > { %v1246_v4 = vrot.slane %v1245_v13, 1 }
 0x2cc   : > { %v1255_v5 = vadd.f32 %v1254_v2, %v1253_v63  ;;  %v1262_v34 = vadd.f32 %v1261_v3, %v1260_v35 }
 0x2cd   : > { %v1247_v6 = vadd.f32 %v1246_v4, %v1245_v13 }
 0x2ce   : > { %v1263_v54 = vrot.slane %v1262_v34, 1 }
 0x2cf   : > { %v1256_v8 = vadd.f32 %v1255_v5, %v1247_v6 }
 0x2d0   : > { %v1264_v9 = vadd.f32 %v1263_v54, %v1262_v34 }
 0x2d2   : > { %v1265_v60 = vadd.f32 %v1264_v9, %v1256_v8 }
 0x2d4   : > { %v1266_v0 = vmax.f32 %v1265_v60, 0.0 }
 0x2d6   : > { %v1267_v14 = vmul.f32 %v1266_v0, %v1227_v10  ;;  %v1268_v15 = vmul.f32 %v1266_v0, %v1228_v11  ;;  %v1269_v16 = vmul.f32 %v1266_v0, %v1229_v12 }
 0x2d8   : > { %v1273_v47 = vsub.f32 0.0, %v1267_v14  ;;  %v1274_v19 = vsub.f32 0.0, %v1268_v15  ;;  %v1275_v20 = vsub.f32 0.0, %v1269_v16 }
 0x2da   : > { %v1276_v21 = vmul.f32 1.442695, %v1273_v47  ;;  %v1278_v24 = vmul.f32 1.442695, %v1274_v19  ;;  %v1280_v7 = vmul.f32 1.442695, %v1275_v20 }
 0x2dc   : > { %1883 = vpow2.f32 %v1276_v21 }
 0x2dd   : > { %1885 = vpow2.f32 %v1278_v24 }
 0x2de   : > { %1887 = vpow2.f32 %v1280_v7 }
 0x2e6   : > { %v1884_v25 = vpop.eup %1883 }
 0x2e7   : > { %v1886_v28 = vpop.eup %1885  ;;  %v1282_v36 = vadd.f32 1.0, %v1884_v25 }
 0x2e8   : > { %v1888_v29 = vpop.eup %1887  ;;  %v1283_v30 = vadd.f32 1.0, %v1886_v28 }
 0x2e9   : > { %v1284_v31 = vadd.f32 1.0, %v1888_v29 }
 0x2ea   : > { %1889 = vrcp.f32 %v1283_v30 }
 0x2eb   : > { %1891 = vrcp.f32 %v1284_v31 }
 0x2ec   : > { %1893 = vrcp.f32 %v1282_v36 }
 0x2f4   : > { %v1890_v62 = vpop.eup %1889 }
 0x2f5   : > { %v1892_v48 = vpop.eup %1891  ;;  %1318 = vperm.xlu1 %1873, %v1890_v62  }
 0x2f6   : > { %1336 = vperm.xlu0 %1874, %v1892_v48   ;;  %v1894_v32 = vpop.eup %1893 }
 0x2f9   : > { %1295 = vperm.xlu1 %1873, %v1894_v32  }
 0x374   : > { %v1319_v17 = vpop.permute.xlu1 %1318 }
 0x375   : > { %v1324_v61 = vrot.slane %v1319_v17, %v1323_v39  ;;  %v1337_v50 = vpop.permute.xlu0 %1336 }
 0x376   : > { %v1342_v18 = vrot.slane %v1337_v50, %v1341_v44 }
 0x377   : > { %v1332_v46 = vmul.f32 %v1324_v61, %v1291_v41  ;;  %v1333_v52 = vmul.f32 %v1324_v61, %v1292_v49 }
 0x378   : > { %v1296_v27 = vpop.permute.xlu1 %1295  ;;  %v1350_v43 = vmul.f32 %v1342_v18, %v1291_v41  ;;  %v1351_v45 = vmul.f32 %v1342_v18, %v1292_v49 }
 0x379   : > { %v1300_v51 = vrot.slane %v1296_v27, %v1299_v42  ;;  %1354 = vrot.lane.b32.xlu1 %v1332_v46, %s1965_s27 }
 0x37b   : > { %v1314_v53 = vmul.f32 %v1300_v51, %v1291_v41  ;;  %v1315_v33 = vmul.f32 %v1300_v51, %v1292_v49 }
 0x37d   : > { %1356 = vrot.lane.b32.xlu1 %v1333_v52, %s1965_s27  ;;  %1807 = vmatmul.mubr.msk.f32.vlgmr.msra.gmra.mrb[0].mxu0 %vm1358_vm14, %v1314_v53 }
 0x37e   : > { %1534 = vmatpush1.msra.mxu0 %v2351_v37  ;;  %1597 = vmatprep.mubr.f32.mxu0 %v1949_v1 }
 0x381   : > { %1525 = vrot.lane.b32.xlu1 %v1350_v43, %s1953_s24 }
 0x385   : > { %1527 = vrot.lane.b32.xlu1 %v1351_v45, %s1953_s24  ;;  %s1816_s24 = sshll.u32 %s2439_s10, 5 }
 0x386   : > { %s399_s16 = scalar_lea.vmem %s2428_s9, %s1816_s24 }
 0x389   : > { %1618 = vperm.xlu1 %1873, %v1614_v55  }
 0x38d   : > { %1623 = vperm.xlu1 %1873, %v1615_v56  }
 0x3eb   : > { %v1355_v57 = vpop.permute.xlu1 %1354 }
 0x3ec   : > { %1805 = vmatmul.mubr.msk.f32.vlgmr.msra.gmra.mrb[0].mxu1 %vm1358_vm14, %v1355_v57 }
 0x3ed   : > { %1818 = vmatpush1.msra.mxu1 %v2343_v26  ;;  %1433 = vmatprep.mubr.f32.mxu1 %v1949_v1 }
 0x3ef   : > { %v1357_v37 = vpop.permute.xlu1 %1356 }
 0x3f0   : > { %1806 = vmatmul.mubr.msk.f32.gmra.mrb[2].mxu1 %vm1358_vm14, %v1357_v37 }
 0x3f1   : > { %1516 = vmatprep.mubr.f32.mxu1 %v1949_v1 }
 0x3f3   : > { %v1526_v58 = vpop.permute.xlu1 %1525 }
 0x3f4   : > { %1809 = vmatmul.mubr.msk.f32.vlgmr.msra.gmra.mrb[0].mxu0 %vm1358_vm14, %v1526_v58 }
 0x3f5   : > { %1603 = vmatprep.mubr.f32.mxu0 %v1949_v1 }
 0x3f7   : > { %v1528_v59 = vpop.permute.xlu1 %1527 }
 0x3f8   : > { %1808 = vmatmul.mubr.msk.f32.vlgmr.msra.gmra.mrb[2].mxu1 %vm1358_vm14, %v1315_v33  ;;  %1810 = vmatmul.mubr.msk.f32.gmra.mrb[2].mxu0 %vm1358_vm14, %v1528_v59 }
 0x408   : > { %v1619_v26 = vpop.permute.xlu1 %1618 }
 0x40c   : > { %v1624_v10 = vpop.permute.xlu1 %1623 }
 0x4bf   : > { %v1429_v63 = vpop.f32.mrb[0].mxu1 }
 0x4c0   : > { %v1431_v35 = vpop.f32.mrb[1].mxu1 }
 0x4c7   : > { %v1599_v13 = vpop.f32.mrb[0].mxu0 }
 0x4c8   : > { %v1819_v2 = vadd.f32 %v1599_v13, %v1429_v63  ;;  %v1601_v3 = vpop.f32.mrb[1].mxu0 }
 0x4c9   : > { %v1820_v4 = vadd.f32 %v1601_v3, %v1431_v35 }
 0x4ca   : > { %v1626_v5 = vadd.f32 %v1819_v2, %v1619_v26 }
 0x4cb   : > { %v1627_v34 = vadd.f32 %v1820_v4, %v1619_v26  ;;  %v1518_v1 = vpop.f32.mrb[2].mxu1  ;;  %v1605_v6 = vpop.f32.mrb[2].mxu0 }
 0x4cc   : > { %v1630_v54 = vmul.f32 %v1626_v5, %v2334_v22  ;;  %v1821_v8 = vadd.f32 %v1605_v6, %v1518_v1  ;;  %v1520_v9 = vpop.f32.mrb[3].mxu1  ;;  %v1607_v60 = vpop.f32.mrb[3].mxu0 }
 0x4cd   : > { %v1631_v11 = vmul.f32 %v1627_v34, %v2337_v23  ;;  %v1822_v12 = vadd.f32 %v1607_v60, %v1520_v9 }
 0x4ce   : > { %1634 = vst [vmem:[%s399_s16] sm:$0xff] %v1630_v54  ;;  %v1628_v0 = vadd.f32 %v1821_v8, %v1624_v10 }
 0x4cf   : > { %1635 = vst [vmem:[%s399_s16 + $0x8] sm:$0xff] %v1631_v11  ;;  %v1629_v14 = vadd.f32 %v1822_v12, %v1624_v10 }
 0x4d0   : > { %v1632_v15 = vmul.f32 %v1628_v0, %v2334_v22 }
 0x4d1   : > { %v1633_v16 = vmul.f32 %v1629_v14, %v2337_v23 }
 0x4d2   : > { %1636 = vst [vmem:[%s399_s16 + $0x10] sm:$0xff] %v1632_v15 }
 0x4d3   : > { %1637 = vst [vmem:[%s399_s16 + $0x18] sm:$0xff] %v1633_v16 }
 0x4d4 PF: > { %s21_s30 = sadd.s32 1, %s1945_s30  }
 0x4d5   : > { %p18_p5 = scmp.ge.s32.totalorder %s21_s30, 4  }
 0x4d7   :  { %20 = sbr.rel (!%p18_p5) target bundleno = 2 (0x2), region = 101 }
 0x4de   :  { %1659 = vsyncpa [#allocation4], 1 }
 0x4df   :  { %1661 = vsyncpa [#allocation4 + $0x1], 1 }
 0x4e0   :  { %1662 = vsyncpa [#allocation6], 1 }

</bundles_post_ra>
